<compile_context>
chip_gen: v5e
topology: v5e:2x2
jax: 0.10.0
libtpu: 0.0.40
codegen_flags: <defaults>
</compile_context>

<pallas_src>
import functools

import jax
import jax.numpy as jnp
from jax import lax
from jax.experimental import pallas as pl
from jax.experimental.pallas import tpu as pltpu


# --------------------------- fused Pallas kernel -----------------------------

def _fused_cnn1d_kernel(x_ref, w1_ref, b1_ref, w2_ref, b2_ref, w3_ref, b3_ref,
                        wf_ref, bf_ref, o_ref, h1_ref, h2_ref, h3_ref, *,
                        ksize, dilation, stride, l1, l2, l3, pool_k, l_pool):
    """One batch element: full CNN1D forward, intermediates in VMEM scratch.

    x_ref:  (L_in, 1)            w1_ref: (K, C1)       b1_ref: (1, C1)
    w2_ref: (K*C1, C2)           b2_ref: (1, C2)       (BN1 pre-folded)
    w3_ref: (K*C2, C3)           b3_ref: (1, C3)       (BN2 pre-folded)
    wf_ref: (l_pool*C3, n_class) bf_ref: (1, n_class)  (BN3 pre-folded)
    o_ref:  (1, n_class)
    h1/h2/h3_ref: VMEM scratch (L1,C1)/(L2,C2)/(L3,C3)
    """
    # ---- layer 1: Conv1d with C_in = 1 -> pure VPU broadcast multiply-accumulate
    acc1 = x_ref[pl.ds(0, l1, stride=stride), :] * w1_ref[0:1, :]          # (L1, C1)
    for k in range(1, ksize):
        xk = x_ref[pl.ds(k * dilation, l1, stride=stride), :]              # (L1, 1)
        acc1 = acc1 + xk * w1_ref[k:k + 1, :]
    h1_ref[...] = jnp.maximum(acc1 + b1_ref[...], 0.0)                     # conv + bias + ReLU

    # ---- layer 2: im2col (lane concat of 9 taps) + ONE MXU dot (K = 9*C1) ----
    cols2 = jnp.concatenate(
        [h1_ref[pl.ds(k * dilation, l2, stride=stride), :] for k in range(ksize)],
        axis=-1)                                                           # (L2, K*C1)
    h2_ref[...] = jnp.maximum(
        jnp.dot(cols2, w2_ref[...], preferred_element_type=jnp.float32) + b2_ref[...],
        0.0)

    # ---- layer 3: im2col + ONE MXU dot (K = 9*C2) ----
    cols3 = jnp.concatenate(
        [h2_ref[pl.ds(k * dilation, l3, stride=stride), :] for k in range(ksize)],
        axis=-1)                                                           # (L3, K*C2)
    h3_ref[...] = jnp.maximum(
        jnp.dot(cols3, w3_ref[...], preferred_element_type=jnp.float32) + b3_ref[...],
        0.0)

    # ---- head: AvgPool1d(pool_k) + flatten + Linear + log_softmax ----
    inv = 1.0 / pool_k
    rows = []
    for l in range(l_pool):                                                # pooled row l
        r = h3_ref[pool_k * l: pool_k * l + 1, :]
        for j in range(1, pool_k):
            r = r + h3_ref[pool_k * l + j: pool_k * l + j + 1, :]
        rows.append(r * inv)                                               # (1, C3)
    pooled_flat = jnp.concatenate(rows, axis=-1)                           # (1, l_pool*C3)

    logits = jnp.dot(pooled_flat, wf_ref[...],
                     preferred_element_type=jnp.float32) + bf_ref[...]     # (1, n_class)
    m = jnp.max(logits, axis=-1, keepdims=True)
    s = logits - m
    o_ref[...] = s - jnp.log(jnp.sum(jnp.exp(s), axis=-1, keepdims=True))  # log_softmax


# --------------------------- host-side wrapper --------------------------------

def out_len(l, k=9, d=3, s=2, pad=0):
    return (l + 2 * pad - d * (k - 1) - 1) // s + 1


def cnn1d_forward(x_nlc, fp, *, stride=2, dilation=3, pool_k=3):
    """x_nlc: (B, L_in, 1) channels-last input; fp: folded params."""
    B, l_in, c_in = x_nlc.shape
    ksize, c1 = fp["w1"].shape
    c2 = fp["w2"].shape[1]
    c3 = fp["w3"].shape[1]
    n_class = fp["wf"].shape[1]
    l1 = out_len(l_in, ksize, dilation, stride)
    l2 = out_len(l1, ksize, dilation, stride)
    l3 = out_len(l2, ksize, dilation, stride)
    l_pool = l3 // pool_k

    kernel = functools.partial(
        _fused_cnn1d_kernel, ksize=ksize, dilation=dilation, stride=stride,
        l1=l1, l2=l2, l3=l3, pool_k=pool_k, l_pool=l_pool)

    out = pl.pallas_call(
        kernel,
        out_shape=jax.ShapeDtypeStruct((B, 1, n_class), jnp.float32),
        grid=(B,),
        in_specs=[
            pl.BlockSpec((None, l_in, c_in), lambda i: (i, 0, 0)),   # x (per batch element)
            pl.BlockSpec(fp["w1"].shape, lambda i: (0, 0)),          # grid-invariant weights
            pl.BlockSpec(fp["b1"].shape, lambda i: (0, 0)),
            pl.BlockSpec(fp["w2"].shape, lambda i: (0, 0)),
            pl.BlockSpec(fp["b2"].shape, lambda i: (0, 0)),
            pl.BlockSpec(fp["w3"].shape, lambda i: (0, 0)),
            pl.BlockSpec(fp["b3"].shape, lambda i: (0, 0)),
            pl.BlockSpec(fp["wf"].shape, lambda i: (0, 0)),
            pl.BlockSpec(fp["bf"].shape, lambda i: (0, 0)),
        ],
        out_specs=pl.BlockSpec((None, 1, n_class), lambda i: (i, 0, 0)),
        scratch_shapes=[
            pltpu.VMEM((l1, c1), jnp.float32),   # h1 stays in VMEM
            pltpu.VMEM((l2, c2), jnp.float32),   # h2
            pltpu.VMEM((l3, c3), jnp.float32),   # h3
        ],
        compiler_params=pltpu.CompilerParams(dimension_semantics=("parallel",)),
    )(x_nlc, fp["w1"], fp["b1"], fp["w2"], fp["b2"], fp["w3"], fp["b3"],
      fp["wf"], fp["bf"])
    return out.reshape(B, n_class)


# --------------------------- params, folding, reference -----------------------

def make_params(key, *, in_channels, c1, k, n_class, l_pool):
    """Raw (PyTorch-like) parameters; conv weights stored as (K, C_in, C_out)."""
    c2, c3 = 2 * c1, c1
    keys = iter(jax.random.split(key, 24))

    def uniform(kk, shape, bound):
        return jax.random.uniform(kk, shape, jnp.float32, -bound, bound)

    raw = {}
    for idx, (cin, cout) in enumerate([(in_channels, c1), (c1, c2), (c2, c3)], start=1):
        bound = 1.0 / float(cin * k) ** 0.5
        raw[f"w{idx}"] = uniform(next(keys), (k, cin, cout), bound)
        raw[f"b{idx}"] = uniform(next(keys), (1, cout), bound)
        raw[f"g{idx}"] = 1.0 + 0.1 * jax.random.normal(next(keys), (1, cout), jnp.float32)
        raw[f"be{idx}"] = 0.1 * jax.random.normal(next(keys), (1, cout), jnp.float32)
        raw[f"m{idx}"] = 0.1 * jax.random.normal(next(keys), (1, cout), jnp.float32)
        raw[f"v{idx}"] = 1.0 + 0.2 * jnp.abs(
            jax.random.normal(next(keys), (1, cout), jnp.float32))

    bound = 1.0 / float(c3 * l_pool) ** 0.5
    raw["wf"] = uniform(next(keys), (l_pool, c3, n_class), bound)   # flatten layout (l, c, n)
    raw["bf"] = uniform(next(keys), (1, n_class), bound)
    return raw


def fold_params(raw, *, eps=1e-5):
    """Fold eval-mode BN of layer n into layer n+1's conv (and BN3 into the fc)."""
    def bn_affine(i):
        s = (raw[f"g{i}"] / jnp.sqrt(raw[f"v{i}"] + eps)).reshape(-1)
        t = (raw[f"be{i}"].reshape(-1) - raw[f"m{i}"].reshape(-1) * s)
        return s, t

    s1, t1 = bn_affine(1)
    s2, t2 = bn_affine(2)
    s3, t3 = bn_affine(3)

    k, _, c1 = raw["w1"].shape
    _, cin2, c2 = raw["w2"].shape
    _, cin3, c3 = raw["w3"].shape
    l_pool, _, n_class = raw["wf"].shape

    fp = {}
    fp["w1"] = raw["w1"][:, 0, :]                                     # (K, C1)  C_in == 1
    fp["b1"] = raw["b1"]
    # conv2 absorbs BN1:  w2' = s1 * w2,  b2' = b2 + sum_{k,i} t1_i * w2[k,i,:]
    fp["w2"] = (raw["w2"] * s1[None, :, None]).reshape(k * cin2, c2)
    fp["b2"] = raw["b2"] + jnp.einsum("kio,i->o", raw["w2"], t1)[None, :]
    # conv3 absorbs BN2
    fp["w3"] = (raw["w3"] * s2[None, :, None]).reshape(k * cin3, c3)
    fp["b3"] = raw["b3"] + jnp.einsum("kio,i->o", raw["w3"], t2)[None, :]
    # fc absorbs BN3 (folded through the linear avgpool)
    fp["wf"] = (raw["wf"] * s3[None, :, None]).reshape(l_pool * c3, n_class)
    fp["bf"] = raw["bf"] + jnp.einsum("lcn,c->n", raw["wf"], t3)[None, :]
    return fp


def reference_forward(x_ncl, raw, *, pool_k=3, eps=1e-5):
    """Pure-JAX reference in PyTorch's NCL layout, using the un-folded params."""
    def conv(x, w_kio, b_1c, stride, dilation):
        w_oik = jnp.transpose(w_kio, (2, 1, 0))                  # (C_out, C_in, K)
        y = lax.conv_general_dilated(
            x, w_oik, window_strides=(stride,), padding="VALID",
            rhs_dilation=(dilation,), dimension_numbers=("NCH", "OIH", "NCH"),
            precision=lax.Precision.HIGHEST)
        return y + b_1c.reshape(1, -1, 1)

    def bn(x, g, b, m, v):
        g, b, m, v = (t.reshape(1, -1, 1) for t in (g, b, m, v))
        return (x - m) / jnp.sqrt(v + eps) * g + b

    h = bn(jax.nn.relu(conv(x_ncl, raw["w1"], raw["b1"], 2, 3)),
           raw["g1"], raw["be1"], raw["m1"], raw["v1"])
    h = bn(jax.nn.relu(conv(h, raw["w2"], raw["b2"], 2, 3)),
           raw["g2"], raw["be2"], raw["m2"], raw["v2"])
    h = bn(jax.nn.relu(conv(h, raw["w3"], raw["b3"], 2, 3)),
           raw["g3"], raw["be3"], raw["m3"], raw["v3"])
    B, C, L = h.shape
    l_pool = L // pool_k
    pooled = h[:, :, :l_pool * pool_k].reshape(B, C, l_pool, pool_k).mean(-1)  # (B, C, l_pool)
    logits = jnp.einsum("bcl,lcn->bn", pooled, raw["wf"],
                        precision=lax.Precision.HIGHEST) + raw["bf"]
    return jax.nn.log_softmax(logits, axis=-1)


# --------------------------------- main ---------------------------------------

if __name__ == "__main__":
    # Small shapes consistent with the module (input_size=256, in_channels=1,
    # out_channels=16, kernel_size=9, n_class=7, batch=2).
    B, C_IN, L_IN = 2, 1, 256
    C1, K, N_CLASS = 16, 9, 7

    l3 = out_len(out_len(out_len(L_IN)))    # 256 -> 116 -> 46 -> 11
    l_pool = l3 // 3                        # AvgPool1d(3) -> 3

    key = jax.random.PRNGKey(0)
    kx, kp = jax.random.split(key)
    raw_params = make_params(kp, in_channels=C_IN, c1=C1, k=K,
                             n_class=N_CLASS, l_pool=l_pool)
    folded = fold_params(raw_params)

    x_ncl = jax.random.normal(kx, (B, C_IN, L_IN), jnp.float32)   # PyTorch NCL input
    x_nlc = jnp.transpose(x_ncl, (0, 2, 1))                       # kernel layout (B, L, C)

    out = cnn1d_forward(x_nlc, folded)
    out = jax.block_until_ready(out)

    ref = reference_forward(x_ncl, raw_params)
    assert out.shape == (B, N_CLASS), out.shape
    assert jnp.allclose(out, ref, atol=2e-2, rtol=2e-2), float(jnp.max(jnp.abs(out - ref)))

    print("KERNEL_OK")
</pallas_src>

<mosaic_0001>
module attributes {stable_mosaic.version = 11 : i64} {
  func.func @_fused_cnn1d_kernel(%arg0: i32, %arg1: memref<1x256x1xf32, #tpu.memory_space<vmem>>, %arg2: memref<9x16xf32, #tpu.memory_space<vmem>>, %arg3: memref<1x16xf32, #tpu.memory_space<vmem>>, %arg4: memref<144x32xf32, #tpu.memory_space<vmem>>, %arg5: memref<1x32xf32, #tpu.memory_space<vmem>>, %arg6: memref<288x16xf32, #tpu.memory_space<vmem>>, %arg7: memref<1x16xf32, #tpu.memory_space<vmem>>, %arg8: memref<48x7xf32, #tpu.memory_space<vmem>>, %arg9: memref<1x7xf32, #tpu.memory_space<vmem>>, %arg10: memref<1x1x7xf32, #tpu.memory_space<vmem>>, %arg11: memref<116x16xf32, #tpu.memory_space<vmem>>, %arg12: memref<46x32xf32, #tpu.memory_space<vmem>>, %arg13: memref<11x16xf32, #tpu.memory_space<vmem>>) attributes {dimension_semantics = [#tpu.dimension_semantics<parallel>], iteration_bounds = array<i64: 2>, scalar_prefetch = 0 : i64, scratch_operands = 3 : i64, tpu.core_type = #tpu.core_type<tc>, window_params = [{transform_indices = @transform_0, window_bounds = array<i64: 1, 256, 1>}, {pipeline_mode = #tpu.pipeline_mode<synchronous>, transform_indices = @transform_1, window_bounds = array<i64: 9, 16>}, {pipeline_mode = #tpu.pipeline_mode<synchronous>, transform_indices = @transform_2, window_bounds = array<i64: 1, 16>}, {pipeline_mode = #tpu.pipeline_mode<synchronous>, transform_indices = @transform_3, window_bounds = array<i64: 144, 32>}, {pipeline_mode = #tpu.pipeline_mode<synchronous>, transform_indices = @transform_4, window_bounds = array<i64: 1, 32>}, {pipeline_mode = #tpu.pipeline_mode<synchronous>, transform_indices = @transform_5, window_bounds = array<i64: 288, 16>}, {pipeline_mode = #tpu.pipeline_mode<synchronous>, transform_indices = @transform_6, window_bounds = array<i64: 1, 16>}, {pipeline_mode = #tpu.pipeline_mode<synchronous>, transform_indices = @transform_7, window_bounds = array<i64: 48, 7>}, {pipeline_mode = #tpu.pipeline_mode<synchronous>, transform_indices = @transform_8, window_bounds = array<i64: 1, 7>}, {transform_indices = @transform_9, window_bounds = array<i64: 1, 1, 7>}]} {
    %c0 = arith.constant 0 : index
    %c0_0 = arith.constant 0 : index
    %c0_1 = arith.constant 0 : index
    %0 = tpu.strided_load %arg1[%c0, %c0_0, %c0_1] {strides = array<i32: 1, 2, 1>} : memref<1x256x1xf32, #tpu.memory_space<vmem>>, vector<1x116x1xf32>
    %1 = vector.shape_cast %0 : vector<1x116x1xf32> to vector<116x1xf32>
    %c0_2 = arith.constant 0 : index
    %c0_3 = arith.constant 0 : index
    %2 = vector.load %arg2[%c0_2, %c0_3] : memref<9x16xf32, #tpu.memory_space<vmem>>, vector<1x16xf32>
    %3 = vector.broadcast %1 : vector<116x1xf32> to vector<116x16xf32>
    %4 = vector.broadcast %2 : vector<1x16xf32> to vector<116x16xf32>
    %5 = arith.mulf %3, %4 : vector<116x16xf32>
    %c0_4 = arith.constant 0 : index
    %c3 = arith.constant 3 : index
    %c0_5 = arith.constant 0 : index
    %6 = tpu.strided_load %arg1[%c0_4, %c3, %c0_5] {strides = array<i32: 1, 2, 1>} : memref<1x256x1xf32, #tpu.memory_space<vmem>>, vector<1x116x1xf32>
    %7 = vector.shape_cast %6 : vector<1x116x1xf32> to vector<116x1xf32>
    %c1 = arith.constant 1 : index
    %c0_6 = arith.constant 0 : index
    %8 = vector.load %arg2[%c1, %c0_6] : memref<9x16xf32, #tpu.memory_space<vmem>>, vector<1x16xf32>
    %9 = vector.broadcast %7 : vector<116x1xf32> to vector<116x16xf32>
    %10 = vector.broadcast %8 : vector<1x16xf32> to vector<116x16xf32>
    %11 = arith.mulf %9, %10 : vector<116x16xf32>
    %12 = arith.addf %5, %11 : vector<116x16xf32>
    %c0_7 = arith.constant 0 : index
    %c6 = arith.constant 6 : index
    %c0_8 = arith.constant 0 : index
    %13 = tpu.strided_load %arg1[%c0_7, %c6, %c0_8] {strides = array<i32: 1, 2, 1>} : memref<1x256x1xf32, #tpu.memory_space<vmem>>, vector<1x116x1xf32>
    %14 = vector.shape_cast %13 : vector<1x116x1xf32> to vector<116x1xf32>
    %c2 = arith.constant 2 : index
    %c0_9 = arith.constant 0 : index
    %15 = vector.load %arg2[%c2, %c0_9] : memref<9x16xf32, #tpu.memory_space<vmem>>, vector<1x16xf32>
    %16 = vector.broadcast %14 : vector<116x1xf32> to vector<116x16xf32>
    %17 = vector.broadcast %15 : vector<1x16xf32> to vector<116x16xf32>
    %18 = arith.mulf %16, %17 : vector<116x16xf32>
    %19 = arith.addf %12, %18 : vector<116x16xf32>
    %c0_10 = arith.constant 0 : index
    %c9 = arith.constant 9 : index
    %c0_11 = arith.constant 0 : index
    %20 = tpu.strided_load %arg1[%c0_10, %c9, %c0_11] {strides = array<i32: 1, 2, 1>} : memref<1x256x1xf32, #tpu.memory_space<vmem>>, vector<1x116x1xf32>
    %21 = vector.shape_cast %20 : vector<1x116x1xf32> to vector<116x1xf32>
    %c3_12 = arith.constant 3 : index
    %c0_13 = arith.constant 0 : index
    %22 = vector.load %arg2[%c3_12, %c0_13] : memref<9x16xf32, #tpu.memory_space<vmem>>, vector<1x16xf32>
    %23 = vector.broadcast %21 : vector<116x1xf32> to vector<116x16xf32>
    %24 = vector.broadcast %22 : vector<1x16xf32> to vector<116x16xf32>
    %25 = arith.mulf %23, %24 : vector<116x16xf32>
    %26 = arith.addf %19, %25 : vector<116x16xf32>
    %c0_14 = arith.constant 0 : index
    %c12 = arith.constant 12 : index
    %c0_15 = arith.constant 0 : index
    %27 = tpu.strided_load %arg1[%c0_14, %c12, %c0_15] {strides = array<i32: 1, 2, 1>} : memref<1x256x1xf32, #tpu.memory_space<vmem>>, vector<1x116x1xf32>
    %28 = vector.shape_cast %27 : vector<1x116x1xf32> to vector<116x1xf32>
    %c4 = arith.constant 4 : index
    %c0_16 = arith.constant 0 : index
    %29 = vector.load %arg2[%c4, %c0_16] : memref<9x16xf32, #tpu.memory_space<vmem>>, vector<1x16xf32>
    %30 = vector.broadcast %28 : vector<116x1xf32> to vector<116x16xf32>
    %31 = vector.broadcast %29 : vector<1x16xf32> to vector<116x16xf32>
    %32 = arith.mulf %30, %31 : vector<116x16xf32>
    %33 = arith.addf %26, %32 : vector<116x16xf32>
    %c0_17 = arith.constant 0 : index
    %c15 = arith.constant 15 : index
    %c0_18 = arith.constant 0 : index
    %34 = tpu.strided_load %arg1[%c0_17, %c15, %c0_18] {strides = array<i32: 1, 2, 1>} : memref<1x256x1xf32, #tpu.memory_space<vmem>>, vector<1x116x1xf32>
    %35 = vector.shape_cast %34 : vector<1x116x1xf32> to vector<116x1xf32>
    %c5 = arith.constant 5 : index
    %c0_19 = arith.constant 0 : index
    %36 = vector.load %arg2[%c5, %c0_19] : memref<9x16xf32, #tpu.memory_space<vmem>>, vector<1x16xf32>
    %37 = vector.broadcast %35 : vector<116x1xf32> to vector<116x16xf32>
    %38 = vector.broadcast %36 : vector<1x16xf32> to vector<116x16xf32>
    %39 = arith.mulf %37, %38 : vector<116x16xf32>
    %40 = arith.addf %33, %39 : vector<116x16xf32>
    %c0_20 = arith.constant 0 : index
    %c18 = arith.constant 18 : index
    %c0_21 = arith.constant 0 : index
    %41 = tpu.strided_load %arg1[%c0_20, %c18, %c0_21] {strides = array<i32: 1, 2, 1>} : memref<1x256x1xf32, #tpu.memory_space<vmem>>, vector<1x116x1xf32>
    %42 = vector.shape_cast %41 : vector<1x116x1xf32> to vector<116x1xf32>
    %c6_22 = arith.constant 6 : index
    %c0_23 = arith.constant 0 : index
    %43 = vector.load %arg2[%c6_22, %c0_23] : memref<9x16xf32, #tpu.memory_space<vmem>>, vector<1x16xf32>
    %44 = vector.broadcast %42 : vector<116x1xf32> to vector<116x16xf32>
    %45 = vector.broadcast %43 : vector<1x16xf32> to vector<116x16xf32>
    %46 = arith.mulf %44, %45 : vector<116x16xf32>
    %47 = arith.addf %40, %46 : vector<116x16xf32>
    %c0_24 = arith.constant 0 : index
    %c21 = arith.constant 21 : index
    %c0_25 = arith.constant 0 : index
    %48 = tpu.strided_load %arg1[%c0_24, %c21, %c0_25] {strides = array<i32: 1, 2, 1>} : memref<1x256x1xf32, #tpu.memory_space<vmem>>, vector<1x116x1xf32>
    %49 = vector.shape_cast %48 : vector<1x116x1xf32> to vector<116x1xf32>
    %c7 = arith.constant 7 : index
    %c0_26 = arith.constant 0 : index
    %50 = vector.load %arg2[%c7, %c0_26] : memref<9x16xf32, #tpu.memory_space<vmem>>, vector<1x16xf32>
    %51 = vector.broadcast %49 : vector<116x1xf32> to vector<116x16xf32>
    %52 = vector.broadcast %50 : vector<1x16xf32> to vector<116x16xf32>
    %53 = arith.mulf %51, %52 : vector<116x16xf32>
    %54 = arith.addf %47, %53 : vector<116x16xf32>
    %c0_27 = arith.constant 0 : index
    %c24 = arith.constant 24 : index
    %c0_28 = arith.constant 0 : index
    %55 = tpu.strided_load %arg1[%c0_27, %c24, %c0_28] {strides = array<i32: 1, 2, 1>} : memref<1x256x1xf32, #tpu.memory_space<vmem>>, vector<1x116x1xf32>
    %56 = vector.shape_cast %55 : vector<1x116x1xf32> to vector<116x1xf32>
    %c8 = arith.constant 8 : index
    %c0_29 = arith.constant 0 : index
    %57 = vector.load %arg2[%c8, %c0_29] : memref<9x16xf32, #tpu.memory_space<vmem>>, vector<1x16xf32>
    %58 = vector.broadcast %56 : vector<116x1xf32> to vector<116x16xf32>
    %59 = vector.broadcast %57 : vector<1x16xf32> to vector<116x16xf32>
    %60 = arith.mulf %58, %59 : vector<116x16xf32>
    %61 = arith.addf %54, %60 : vector<116x16xf32>
    %c0_30 = arith.constant 0 : index
    %c0_31 = arith.constant 0 : index
    %62 = vector.load %arg3[%c0_30, %c0_31] : memref<1x16xf32, #tpu.memory_space<vmem>>, vector<1x16xf32>
    %63 = vector.broadcast %62 : vector<1x16xf32> to vector<116x16xf32>
    %64 = arith.addf %61, %63 : vector<116x16xf32>
    %cst = arith.constant 0.000000e+00 : f32
    %65 = vector.broadcast %cst : f32 to vector<116x16xf32>
    %66 = arith.maximumf %64, %65 : vector<116x16xf32>
    %c0_32 = arith.constant 0 : index
    %c0_33 = arith.constant 0 : index
    %67 = vector.load %arg11[%c0_32, %c0_33] : memref<116x16xf32, #tpu.memory_space<vmem>>, vector<116x16xf32>
    tpu.vector_store %arg11[%c0_32, %c0_33], %66 {strides = array<i32>} : memref<116x16xf32, #tpu.memory_space<vmem>>, vector<116x16xf32>,
    %c0_34 = arith.constant 0 : index
    %c0_35 = arith.constant 0 : index
    %68 = tpu.strided_load %arg11[%c0_34, %c0_35] {strides = array<i32: 2, 1>} : memref<116x16xf32, #tpu.memory_space<vmem>>, vector<46x16xf32>
    %c3_36 = arith.constant 3 : index
    %c0_37 = arith.constant 0 : index
    %69 = tpu.strided_load %arg11[%c3_36, %c0_37] {strides = array<i32: 2, 1>} : memref<116x16xf32, #tpu.memory_space<vmem>>, vector<46x16xf32>
    %c6_38 = arith.constant 6 : index
    %c0_39 = arith.constant 0 : index
    %70 = tpu.strided_load %arg11[%c6_38, %c0_39] {strides = array<i32: 2, 1>} : memref<116x16xf32, #tpu.memory_space<vmem>>, vector<46x16xf32>
    %c9_40 = arith.constant 9 : index
    %c0_41 = arith.constant 0 : index
    %71 = tpu.strided_load %arg11[%c9_40, %c0_41] {strides = array<i32: 2, 1>} : memref<116x16xf32, #tpu.memory_space<vmem>>, vector<46x16xf32>
    %c12_42 = arith.constant 12 : index
    %c0_43 = arith.constant 0 : index
    %72 = tpu.strided_load %arg11[%c12_42, %c0_43] {strides = array<i32: 2, 1>} : memref<116x16xf32, #tpu.memory_space<vmem>>, vector<46x16xf32>
    %c15_44 = arith.constant 15 : index
    %c0_45 = arith.constant 0 : index
    %73 = tpu.strided_load %arg11[%c15_44, %c0_45] {strides = array<i32: 2, 1>} : memref<116x16xf32, #tpu.memory_space<vmem>>, vector<46x16xf32>
    %c18_46 = arith.constant 18 : index
    %c0_47 = arith.constant 0 : index
    %74 = tpu.strided_load %arg11[%c18_46, %c0_47] {strides = array<i32: 2, 1>} : memref<116x16xf32, #tpu.memory_space<vmem>>, vector<46x16xf32>
    %c21_48 = arith.constant 21 : index
    %c0_49 = arith.constant 0 : index
    %75 = tpu.strided_load %arg11[%c21_48, %c0_49] {strides = array<i32: 2, 1>} : memref<116x16xf32, #tpu.memory_space<vmem>>, vector<46x16xf32>
    %c24_50 = arith.constant 24 : index
    %c0_51 = arith.constant 0 : index
    %76 = tpu.strided_load %arg11[%c24_50, %c0_51] {strides = array<i32: 2, 1>} : memref<116x16xf32, #tpu.memory_space<vmem>>, vector<46x16xf32>
    %77 = tpu.concatenate %68, %69, %70, %71, %72, %73, %74, %75, %76 in 1 : vector<46x16xf32>, vector<46x16xf32>, vector<46x16xf32>, vector<46x16xf32>, vector<46x16xf32>, vector<46x16xf32>, vector<46x16xf32>, vector<46x16xf32>, vector<46x16xf32> -> vector<46x144xf32>
    %c0_52 = arith.constant 0 : index
    %c0_53 = arith.constant 0 : index
    %78 = vector.load %arg4[%c0_52, %c0_53] : memref<144x32xf32, #tpu.memory_space<vmem>>, vector<144x32xf32>
    %cst_54 = arith.constant dense<0.000000e+00> : vector<46x32xf32>
    %79 = tpu.matmul %77, %78, %cst_54 {dimension_numbers = #tpu.dot_dimension_numbers<[1], [0], [0], [1], [0, 0, 1, 1], [], []>} : vector<46x144xf32>, vector<144x32xf32>, vector<46x32xf32> -> vector<46x32xf32>
    %c0_55 = arith.constant 0 : index
    %c0_56 = arith.constant 0 : index
    %80 = vector.load %arg5[%c0_55, %c0_56] : memref<1x32xf32, #tpu.memory_space<vmem>>, vector<1x32xf32>
    %81 = vector.broadcast %80 : vector<1x32xf32> to vector<46x32xf32>
    %82 = arith.addf %79, %81 : vector<46x32xf32>
    %cst_57 = arith.constant 0.000000e+00 : f32
    %83 = vector.broadcast %cst_57 : f32 to vector<46x32xf32>
    %84 = arith.maximumf %82, %83 : vector<46x32xf32>
    %c0_58 = arith.constant 0 : index
    %c0_59 = arith.constant 0 : index
    %85 = vector.load %arg12[%c0_58, %c0_59] : memref<46x32xf32, #tpu.memory_space<vmem>>, vector<46x32xf32>
    tpu.vector_store %arg12[%c0_58, %c0_59], %84 {strides = array<i32>} : memref<46x32xf32, #tpu.memory_space<vmem>>, vector<46x32xf32>,
    %c0_60 = arith.constant 0 : index
    %c0_61 = arith.constant 0 : index
    %86 = tpu.strided_load %arg12[%c0_60, %c0_61] {strides = array<i32: 2, 1>} : memref<46x32xf32, #tpu.memory_space<vmem>>, vector<11x32xf32>
    %c3_62 = arith.constant 3 : index
    %c0_63 = arith.constant 0 : index
    %87 = tpu.strided_load %arg12[%c3_62, %c0_63] {strides = array<i32: 2, 1>} : memref<46x32xf32, #tpu.memory_space<vmem>>, vector<11x32xf32>
    %c6_64 = arith.constant 6 : index
    %c0_65 = arith.constant 0 : index
    %88 = tpu.strided_load %arg12[%c6_64, %c0_65] {strides = array<i32: 2, 1>} : memref<46x32xf32, #tpu.memory_space<vmem>>, vector<11x32xf32>
    %c9_66 = arith.constant 9 : index
    %c0_67 = arith.constant 0 : index
    %89 = tpu.strided_load %arg12[%c9_66, %c0_67] {strides = array<i32: 2, 1>} : memref<46x32xf32, #tpu.memory_space<vmem>>, vector<11x32xf32>
    %c12_68 = arith.constant 12 : index
    %c0_69 = arith.constant 0 : index
    %90 = tpu.strided_load %arg12[%c12_68, %c0_69] {strides = array<i32: 2, 1>} : memref<46x32xf32, #tpu.memory_space<vmem>>, vector<11x32xf32>
    %c15_70 = arith.constant 15 : index
    %c0_71 = arith.constant 0 : index
    %91 = tpu.strided_load %arg12[%c15_70, %c0_71] {strides = array<i32: 2, 1>} : memref<46x32xf32, #tpu.memory_space<vmem>>, vector<11x32xf32>
    %c18_72 = arith.constant 18 : index
    %c0_73 = arith.constant 0 : index
    %92 = tpu.strided_load %arg12[%c18_72, %c0_73] {strides = array<i32: 2, 1>} : memref<46x32xf32, #tpu.memory_space<vmem>>, vector<11x32xf32>
    %c21_74 = arith.constant 21 : index
    %c0_75 = arith.constant 0 : index
    %93 = tpu.strided_load %arg12[%c21_74, %c0_75] {strides = array<i32: 2, 1>} : memref<46x32xf32, #tpu.memory_space<vmem>>, vector<11x32xf32>
    %c24_76 = arith.constant 24 : index
    %c0_77 = arith.constant 0 : index
    %94 = tpu.strided_load %arg12[%c24_76, %c0_77] {strides = array<i32: 2, 1>} : memref<46x32xf32, #tpu.memory_space<vmem>>, vector<11x32xf32>
    %95 = tpu.concatenate %86, %87, %88, %89, %90, %91, %92, %93, %94 in 1 : vector<11x32xf32>, vector<11x32xf32>, vector<11x32xf32>, vector<11x32xf32>, vector<11x32xf32>, vector<11x32xf32>, vector<11x32xf32>, vector<11x32xf32>, vector<11x32xf32> -> vector<11x288xf32>
    %c0_78 = arith.constant 0 : index
    %c0_79 = arith.constant 0 : index
    %96 = vector.load %arg6[%c0_78, %c0_79] : memref<288x16xf32, #tpu.memory_space<vmem>>, vector<288x16xf32>
    %cst_80 = arith.constant dense<0.000000e+00> : vector<11x16xf32>
    %97 = tpu.matmul %95, %96, %cst_80 {dimension_numbers = #tpu.dot_dimension_numbers<[1], [0], [0], [1], [0, 0, 1, 1], [], []>} : vector<11x288xf32>, vector<288x16xf32>, vector<11x16xf32> -> vector<11x16xf32>
    %c0_81 = arith.constant 0 : index
    %c0_82 = arith.constant 0 : index
    %98 = vector.load %arg7[%c0_81, %c0_82] : memref<1x16xf32, #tpu.memory_space<vmem>>, vector<1x16xf32>
    %99 = vector.broadcast %98 : vector<1x16xf32> to vector<11x16xf32>
    %100 = arith.addf %97, %99 : vector<11x16xf32>
    %cst_83 = arith.constant 0.000000e+00 : f32
    %101 = vector.broadcast %cst_83 : f32 to vector<11x16xf32>
    %102 = arith.maximumf %100, %101 : vector<11x16xf32>
    %c0_84 = arith.constant 0 : index
    %c0_85 = arith.constant 0 : index
    %103 = vector.load %arg13[%c0_84, %c0_85] : memref<11x16xf32, #tpu.memory_space<vmem>>, vector<11x16xf32>
    tpu.vector_store %arg13[%c0_84, %c0_85], %102 {strides = array<i32>} : memref<11x16xf32, #tpu.memory_space<vmem>>, vector<11x16xf32>,
    %c0_86 = arith.constant 0 : index
    %c0_87 = arith.constant 0 : index
    %104 = vector.load %arg13[%c0_86, %c0_87] : memref<11x16xf32, #tpu.memory_space<vmem>>, vector<1x16xf32>
    %c1_88 = arith.constant 1 : index
    %c0_89 = arith.constant 0 : index
    %105 = vector.load %arg13[%c1_88, %c0_89] : memref<11x16xf32, #tpu.memory_space<vmem>>, vector<1x16xf32>
    %106 = arith.addf %104, %105 : vector<1x16xf32>
    %c2_90 = arith.constant 2 : index
    %c0_91 = arith.constant 0 : index
    %107 = vector.load %arg13[%c2_90, %c0_91] : memref<11x16xf32, #tpu.memory_space<vmem>>, vector<1x16xf32>
    %108 = arith.addf %106, %107 : vector<1x16xf32>
    %cst_92 = arith.constant 0.333333343 : f32
    %109 = vector.broadcast %cst_92 : f32 to vector<1x16xf32>
    %110 = arith.mulf %108, %109 : vector<1x16xf32>
    %c3_93 = arith.constant 3 : index
    %c0_94 = arith.constant 0 : index
    %111 = vector.load %arg13[%c3_93, %c0_94] : memref<11x16xf32, #tpu.memory_space<vmem>>, vector<1x16xf32>
    %c4_95 = arith.constant 4 : index
    %c0_96 = arith.constant 0 : index
    %112 = vector.load %arg13[%c4_95, %c0_96] : memref<11x16xf32, #tpu.memory_space<vmem>>, vector<1x16xf32>
    %113 = arith.addf %111, %112 : vector<1x16xf32>
    %c5_97 = arith.constant 5 : index
    %c0_98 = arith.constant 0 : index
    %114 = vector.load %arg13[%c5_97, %c0_98] : memref<11x16xf32, #tpu.memory_space<vmem>>, vector<1x16xf32>
    %115 = arith.addf %113, %114 : vector<1x16xf32>
    %cst_99 = arith.constant 0.333333343 : f32
    %116 = vector.broadcast %cst_99 : f32 to vector<1x16xf32>
    %117 = arith.mulf %115, %116 : vector<1x16xf32>
    %c6_100 = arith.constant 6 : index
    %c0_101 = arith.constant 0 : index
    %118 = vector.load %arg13[%c6_100, %c0_101] : memref<11x16xf32, #tpu.memory_space<vmem>>, vector<1x16xf32>
    %c7_102 = arith.constant 7 : index
    %c0_103 = arith.constant 0 : index
    %119 = vector.load %arg13[%c7_102, %c0_103] : memref<11x16xf32, #tpu.memory_space<vmem>>, vector<1x16xf32>
    %120 = arith.addf %118, %119 : vector<1x16xf32>
    %c8_104 = arith.constant 8 : index
    %c0_105 = arith.constant 0 : index
    %121 = vector.load %arg13[%c8_104, %c0_105] : memref<11x16xf32, #tpu.memory_space<vmem>>, vector<1x16xf32>
    %122 = arith.addf %120, %121 : vector<1x16xf32>
    %cst_106 = arith.constant 0.333333343 : f32
    %123 = vector.broadcast %cst_106 : f32 to vector<1x16xf32>
    %124 = arith.mulf %122, %123 : vector<1x16xf32>
    %125 = tpu.concatenate %110, %117, %124 in 1 : vector<1x16xf32>, vector<1x16xf32>, vector<1x16xf32> -> vector<1x48xf32>
    %c0_107 = arith.constant 0 : index
    %c0_108 = arith.constant 0 : index
    %126 = vector.load %arg8[%c0_107, %c0_108] : memref<48x7xf32, #tpu.memory_space<vmem>>, vector<48x7xf32>
    %cst_109 = arith.constant dense<0.000000e+00> : vector<1x7xf32>
    %127 = tpu.matmul %125, %126, %cst_109 {dimension_numbers = #tpu.dot_dimension_numbers<[1], [0], [0], [1], [0, 0, 1, 1], [], []>} : vector<1x48xf32>, vector<48x7xf32>, vector<1x7xf32> -> vector<1x7xf32>
    %c0_110 = arith.constant 0 : index
    %c0_111 = arith.constant 0 : index
    %128 = vector.load %arg9[%c0_110, %c0_111] : memref<1x7xf32, #tpu.memory_space<vmem>>, vector<1x7xf32>
    %129 = arith.addf %127, %128 : vector<1x7xf32>
    %cst_112 = arith.constant dense<0xFF800000> : vector<1xf32>
    %130 = vector.multi_reduction <maximumf>, %129, %cst_112 [1] : vector<1x7xf32> to vector<1xf32>
    %131 = vector.shape_cast %130 : vector<1xf32> to vector<1x1xf32>
    %132 = vector.broadcast %131 : vector<1x1xf32> to vector<1x7xf32>
    %133 = arith.subf %129, %132 : vector<1x7xf32>
    %134 = math.exp %133 : vector<1x7xf32>
    %cst_113 = arith.constant dense<0.000000e+00> : vector<1xf32>
    %135 = vector.multi_reduction <add>, %134, %cst_113 [1] : vector<1x7xf32> to vector<1xf32>
    %136 = vector.shape_cast %135 : vector<1xf32> to vector<1x1xf32>
    %137 = math.log %136 : vector<1x1xf32>
    %138 = vector.broadcast %137 : vector<1x1xf32> to vector<1x7xf32>
    %139 = arith.subf %133, %138 : vector<1x7xf32>
    %c0_114 = arith.constant 0 : index
    %c0_115 = arith.constant 0 : index
    %c0_116 = arith.constant 0 : index
    %140 = vector.load %arg10[%c0_114, %c0_115, %c0_116] : memref<1x1x7xf32, #tpu.memory_space<vmem>>, vector<1x1x7xf32>
    %141 = vector.shape_cast %140 : vector<1x1x7xf32> to vector<1x7xf32>
    %142 = vector.shape_cast %139 : vector<1x7xf32> to vector<1x1x7xf32>
    tpu.vector_store %arg10[%c0_114, %c0_115, %c0_116], %142 {strides = array<i32>} : memref<1x1x7xf32, #tpu.memory_space<vmem>>, vector<1x1x7xf32>,
    return
  }
  func.func @transform_0(%arg0: i32) -> (i32, i32, i32) {
    %c0_i32 = arith.constant 0 : i32
    %c0_i32_0 = arith.constant 0 : i32
    %c0_i32_1 = arith.constant 0 : i32
    return %arg0, %c0_i32, %c0_i32_0 : i32, i32, i32
  }
  func.func @transform_1(%arg0: i32) -> (i32, i32) {
    %c0_i32 = arith.constant 0 : i32
    %c0_i32_0 = arith.constant 0 : i32
    %c0_i32_1 = arith.constant 0 : i32
    return %c0_i32, %c0_i32_0 : i32, i32
  }
  func.func @transform_2(%arg0: i32) -> (i32, i32) {
    %c0_i32 = arith.constant 0 : i32
    %c0_i32_0 = arith.constant 0 : i32
    %c0_i32_1 = arith.constant 0 : i32
    return %c0_i32, %c0_i32_0 : i32, i32
  }
  func.func @transform_3(%arg0: i32) -> (i32, i32) {
    %c0_i32 = arith.constant 0 : i32
    %c0_i32_0 = arith.constant 0 : i32
    %c0_i32_1 = arith.constant 0 : i32
    return %c0_i32, %c0_i32_0 : i32, i32
  }
  func.func @transform_4(%arg0: i32) -> (i32, i32) {
    %c0_i32 = arith.constant 0 : i32
    %c0_i32_0 = arith.constant 0 : i32
    %c0_i32_1 = arith.constant 0 : i32
    return %c0_i32, %c0_i32_0 : i32, i32
  }
  func.func @transform_5(%arg0: i32) -> (i32, i32) {
    %c0_i32 = arith.constant 0 : i32
    %c0_i32_0 = arith.constant 0 : i32
    %c0_i32_1 = arith.constant 0 : i32
    return %c0_i32, %c0_i32_0 : i32, i32
  }
  func.func @transform_6(%arg0: i32) -> (i32, i32) {
    %c0_i32 = arith.constant 0 : i32
    %c0_i32_0 = arith.constant 0 : i32
    %c0_i32_1 = arith.constant 0 : i32
    return %c0_i32, %c0_i32_0 : i32, i32
  }
  func.func @transform_7(%arg0: i32) -> (i32, i32) {
    %c0_i32 = arith.constant 0 : i32
    %c0_i32_0 = arith.constant 0 : i32
    %c0_i32_1 = arith.constant 0 : i32
    return %c0_i32, %c0_i32_0 : i32, i32
  }
  func.func @transform_8(%arg0: i32) -> (i32, i32) {
    %c0_i32 = arith.constant 0 : i32
    %c0_i32_0 = arith.constant 0 : i32
    %c0_i32_1 = arith.constant 0 : i32
    return %c0_i32, %c0_i32_0 : i32, i32
  }
  func.func @transform_9(%arg0: i32) -> (i32, i32, i32) {
    %c0_i32 = arith.constant 0 : i32
    %c0_i32_0 = arith.constant 0 : i32
    %c0_i32_1 = arith.constant 0 : i32
    return %arg0, %c0_i32, %c0_i32_0 : i32, i32, i32
  }
}

</mosaic_0001>

<bundles_post_ra>
// kernel: tpu_custom_call.1
= control target key start
LH: loop header
LB: loop body
LE: loop exit
PB: predicated region body
PF: predicated region fallthrough
CT: control target
= control target key end

     0   :  { %14 = vsyncpa [#allocation6], 0  ;;  %s3804_s0 = inlined_call_operand.vmem [shape: f32[2,256,1], index: 0, kind: input, shape index: {}]   ;;  %s3805_s1 = inlined_call_operand.vmem [shape: f32[9,16], index: 1, kind: input, shape index: {}]   ;;  %s3806_s2 = inlined_call_operand.vmem [shape: f32[1,16], index: 2, kind: input, shape index: {}]   ;;  %s3807_s3 = inlined_call_operand.vmem [shape: f32[144,32], index: 3, kind: input, shape index: {}]   ;;  %s3808_s4 = inlined_call_operand.vmem [shape: f32[1,32], index: 4, kind: input, shape index: {}]   ;;  %s3809_s5 = inlined_call_operand.vmem [shape: f32[288,16], index: 5, kind: input, shape index: {}]   ;;  %s3810_s6 = inlined_call_operand.vmem [shape: f32[1,16], index: 6, kind: input, shape index: {}]   ;;  %s3811_s7 = inlined_call_operand.vmem [shape: f32[48,7], index: 7, kind: input, shape index: {}]   ;;  %s3812_s8 = inlined_call_operand.vmem [shape: f32[1,7], index: 8, kind: input, shape index: {}]   ;;  %s3813_s9 = inlined_call_operand.hbm [shape: f32[2,1,7], index: 9, kind: output, shape index: {}]  }
   0x1   :  { %16 = vsyncpa [#allocation6 + $0x1], 0  ;;  %s2842_s30 = smov 0   ;;  %s2844_s10 = smov 0  }
   0x2   :  { %s2846_s11 = smov 0   ;;  %s2848_s12 = smov 0  }
   0x3 LB: > { %s2863_s13 = sadd.s32 4294967295, %s2782_s12   ;;  %s2399_s14 = sadd.s32 4294967294, %s2782_s12   ;;  %s2782_s12 = sphi %s2848_s12, %s3829_s12   ;;  %s2778_s11 = sphi %s2846_s11, %s3828_s11   ;;  %s2774_s10 = sphi %s2844_s10, %s3827_s10   ;;  %s2770_s30 = sphi %s2842_s30, %s3826_s30  }
   0x4   : > { %s2867_s15 = sadd.s32 1, %s2782_s12   ;;  %s223_s16 = sadd.s32 1, %s2778_s11 }
   0x5   : > { %s220_s17 = ssub.s32 %s2782_s12, %s2867_s15  ;;  %p233_p0 = scmp.ne.s32.totalorder %s2778_s11, %s2774_s10 }
   0x6   : > { %p221_p1 = scmp.eq.s32.totalorder %s220_s17, 0  ;;  %p234_p2 = scmp.eq.s32.totalorder %s2863_s13, 1 }
   0x7   : > { %p239_p3 = scmp.ne.s32.totalorder %s2774_s10, %s2770_s30  ;;  %p240_p4 = scmp.eq.s32.totalorder %s2399_s14, 1 }
   0x8   : > { %s2878_s18 = scalar_select %p221_p1, %s2778_s11, %s223_s16  }
   0x9   : > { %p2880_p5 = por %p234_p2, %p233_p0  ;;  %p2884_p6 = por %p240_p4, %p239_p3 }
   0xa   : > { %p2402_p7 = scmp.ge.s32.totalorder %s2782_s12, 1  ;;  %p290_p8 = scmp.lt.s32.totalorder %s2782_s12, 3 }
   0xc   : > { %p291_p9 = pnand %p2402_p7, %p290_p8 }
   0xd   : > { %p325_p10 = scmp.lt.s32.totalorder (!%p291_p9), %s2863_s13, 1  ;;  %s3817_s28 = smov (!%p291_p9), 16  }
   0xe   : > { %294 = sbr.rel (%p291_p9) target bundleno = 1536 (0x600), region = 56  ;;  %s3816_s29 = smov (!%p291_p9), 48  }
   0xf   : > { %s3814_s14 = smov (!%p291_p9), 32   ;;  %s2788_s16 = smov (!%p291_p9), 64  }
  0x10   : > { %s2789_s17 = smov (!%p291_p9), 80   ;;  %s3823_s26 = smov (!%p291_p9), 32  }
  0x11   : > { %s2340_s23 = scalar_lea.hbm (!%p291_p9), %s3813_s9, %s2863_s13 }
  0x13   : > { %v2784_v0 = vmov 0   ;;  %s326_s21 = scalar_select %p325_p10, %s2863_s13, 1  ;;  %vm1581_vm0 = vcmask 130048   ;;  %vm1879_vm1 = vcmask 261120   ;;  %vm1886_vm2 = vcmask 392192  }
  0x14   : > { %2600 = vset.pattern.permute.xlu2 %v2784_v0  ;;  %2599 = vset.pattern.permute.xlu1 %v2784_v0  ;;  %vm1893_vm3 = vcmask 523264   ;;  %vm1900_vm4 = vcmask 654336   ;;  %vm1907_vm5 = vcmask 785408   ;;  %vm1914_vm6 = vcmask 916480  }
  0x15   : > { %2598 = vset.pattern.permute.xlu0 %v2784_v0  ;;  %s2550_s22 = sshll.u32 %s326_s21, 8  ;;  %s2790_s21 = smov 112   ;;  %vm1596_vm7 = vcmask 125952   ;;  %vm2042_vm8 = vcmask 259072   ;;  %vm2257_vm9 = vcmask 124928   ;;  %vm2317_vm10 = vcmask 49152  }
  0x16   : > { %s2895_s25 = scalar_lea.vmem %s3804_s0, %s2550_s22  ;;  %s3818_s22 = smov 96  }
  0x17   : > { %v2408_v1 = vld [vmem:[%s2895_s25 + $0x40] ss:$2 sm:$0xff]  ;;  %v2409_v4 = vld [vmem:[%s2895_s25 + $0x50] ss:$2 sm:$0xff]  ;;  %v2421_v16 = vld [vmem:[%s2895_s25 + $0x23] ss:$2 sm:$0xff] }
  0x18   : > { %v2406_v2 = vld [vmem:[%s2895_s25 + $0x20] ss:$2 sm:$0xff]  ;;  %382 = vperm.xlu2 %2600, %v2408_v1   ;;  %v2407_v5 = vld [vmem:[%s2895_s25 + $0x30] ss:$2 sm:$0xff]  ;;  %v2420_v17 = vld [vmem:[%s2895_s25 + $0x13] ss:$2 sm:$0xff] }
  0x19   : > { %v330_v3 = vld [vmem:[%s2895_s25] ss:$2 sm:$0xff]  ;;  %372 = vperm.xlu1 %2599, %v2406_v2   ;;  %v2405_v6 = vld [vmem:[%s2895_s25 + $0x10] ss:$2 sm:$0xff]  ;;  %v2419_v18 = vld [vmem:[%s2895_s25 + $0x3] ss:$2 sm:$0xff] }
  0x1a   : > { %362 = vperm.xlu0 %2598, %v330_v3   ;;  %v2412_v7 = vld [vmem:[%s2895_s25 + $0x80] ss:$2 sm:$0xff]  ;;  %v2411_v8 = vld [vmem:[%s2895_s25 + $0x70] ss:$2 sm:$0xff]  ;;  %v2424_v19 = vld [vmem:[%s2895_s25 + $0x53] ss:$2 sm:$0xff] }
  0x1b   : > { %v2410_v9 = vld [vmem:[%s2895_s25 + $0x60] ss:$2 sm:$0xff]  ;;  %v2415_v10 = vld [vmem:[%s2895_s25 + $0xb0] ss:$2 sm:$0xff]  ;;  %v2423_v20 = vld [vmem:[%s2895_s25 + $0x43] ss:$2 sm:$0xff] }
  0x1c   : > { %v2414_v11 = vld [vmem:[%s2895_s25 + $0xa0] ss:$2 sm:$0xff]  ;;  %v2413_v12 = vld [vmem:[%s2895_s25 + $0x90] ss:$2 sm:$0xff]  ;;  %v2422_v21 = vld [vmem:[%s2895_s25 + $0x33] ss:$2 sm:$0xff] }
  0x1d   : > { %v2418_v13 = vld [vmem:[%s2895_s25 + $0xe0] ss:$2 sm:$0xf]  ;;  %v2417_v14 = vld [vmem:[%s2895_s25 + $0xd0] ss:$2 sm:$0xff] }
  0x1e   : > { %v2416_v15 = vld [vmem:[%s2895_s25 + $0xc0] ss:$2 sm:$0xff]  ;;  %v2427_v22 = vld [vmem:[%s2895_s25 + $0x83] ss:$2 sm:$0xff]  ;;  %v2426_v23 = vld [vmem:[%s2895_s25 + $0x73] ss:$2 sm:$0xff] }
  0x1f   : > { %v2425_v24 = vld [vmem:[%s2895_s25 + $0x63] ss:$2 sm:$0xff]  ;;  %v2430_v25 = vld [vmem:[%s2895_s25 + $0xb3] ss:$2 sm:$0xff]  ;;  %v2436_v31 = vld [vmem:[%s2895_s25 + $0x26] ss:$2 sm:$0xff] }
  0x20   : > { %387 = vperm.xlu2 %2600, %v2409_v4   ;;  %v2429_v26 = vld [vmem:[%s2895_s25 + $0xa3] ss:$2 sm:$0xff]  ;;  %v2428_v27 = vld [vmem:[%s2895_s25 + $0x93] ss:$2 sm:$0xff]  ;;  %v2435_v32 = vld [vmem:[%s2895_s25 + $0x16] ss:$2 sm:$0xff] }
  0x21   : > { %377 = vperm.xlu1 %2599, %v2407_v5   ;;  %v2433_v28 = vld [vmem:[%s2895_s25 + $0xe3] ss:$2 sm:$0xf]  ;;  %v2432_v29 = vld [vmem:[%s2895_s25 + $0xd3] ss:$2 sm:$0xff] }
  0x22   : > { %367 = vperm.xlu0 %2598, %v2405_v6   ;;  %v2431_v30 = vld [vmem:[%s2895_s25 + $0xc3] ss:$2 sm:$0xff]  ;;  %v2434_v33 = vld [vmem:[%s2895_s25 + $0x6] ss:$2 sm:$0xff]  ;;  %v2439_v34 = vld [vmem:[%s2895_s25 + $0x56] ss:$2 sm:$0xff] }
  0x23   : > { %v2438_v35 = vld [vmem:[%s2895_s25 + $0x46] ss:$2 sm:$0xff]  ;;  %v2437_v36 = vld [vmem:[%s2895_s25 + $0x36] ss:$2 sm:$0xff]  ;;  %v2451_v42 = vld [vmem:[%s2895_s25 + $0x29] ss:$2 sm:$0xff] }
  0x24   : > { %v2442_v38 = vld [vmem:[%s2895_s25 + $0x86] ss:$2 sm:$0xff]  ;;  %v2441_v39 = vld [vmem:[%s2895_s25 + $0x76] ss:$2 sm:$0xff]  ;;  %v2450_v43 = vld [vmem:[%s2895_s25 + $0x19] ss:$2 sm:$0xff] }
  0x25   : > { %v2440_v40 = vld [vmem:[%s2895_s25 + $0x66] ss:$2 sm:$0xff]  ;;  %v2449_v44 = vld [vmem:[%s2895_s25 + $0x9] ss:$2 sm:$0xff]  ;;  %v2452_v54 = vld [vmem:[%s2895_s25 + $0x39] ss:$2 sm:$0xff] }
  0x26   : > { %v2466_v46 = vld [vmem:[%s2895_s25 + $0x2c] ss:$2 sm:$0xff]  ;;  %v2465_v47 = vld [vmem:[%s2895_s25 + $0x1c] ss:$2 sm:$0xff]  ;;  %v2480_v52 = vld [vmem:[%s2895_s25 + $0x1f] ss:$2 sm:$0xff] }
  0x27   : > { %v2464_v48 = vld [vmem:[%s2895_s25 + $0xc] ss:$2 sm:$0xff]  ;;  %v2479_v53 = vld [vmem:[%s2895_s25 + $0xf] ss:$2 sm:$0xff]  ;;  %v2467_v58 = vld [vmem:[%s2895_s25 + $0x3c] ss:$2 sm:$0xff] }
  0x28   : > { %402 = vperm.xlu2 %2600, %v2412_v7   ;;  %v2453_v59 = vld [vmem:[%s2895_s25 + $0x49] ss:$2 sm:$0xff]  ;;  %v2496_v0 = vld [vmem:[%s2895_s25 + $0x32] ss:$2 sm:$0xff]  ;;  %v2495_v1 = vld [vmem:[%s2895_s25 + $0x22] ss:$2 sm:$0xff] }
  0x29   : > { %397 = vperm.xlu1 %2599, %v2411_v8   ;;  %v2481_v60 = vld [vmem:[%s2895_s25 + $0x2f] ss:$2 sm:$0xff]  ;;  %v2494_v2 = vld [vmem:[%s2895_s25 + $0x12] ss:$2 sm:$0xff]  ;;  %v2482_v7 = vld [vmem:[%s2895_s25 + $0x3f] ss:$2 sm:$0xff] }
  0x2a   : > { %392 = vperm.xlu0 %2598, %v2410_v9   ;;  %v2509_v6 = vld [vmem:[%s2895_s25 + $0x15] ss:$2 sm:$0xff]  ;;  %v2468_v8 = vld [vmem:[%s2895_s25 + $0x4c] ss:$2 sm:$0xff]  ;;  %v2977_v9 = vld [vmem:[%s3805_s1] ss:$0 sm:$0xff] }
  0x30   : > { %417 = vperm.xlu2 %2600, %v2415_v10   ;;  %v2982_v10 = vld [vmem:[%s3805_s1 + $0x1] ss:$0 sm:$0xff] }
  0x31   : > { %412 = vperm.xlu1 %2599, %v2414_v11  }
  0x32   : > { %407 = vperm.xlu0 %2598, %v2413_v12  }
  0x38   : > { %432 = vperm.xlu2 %2600, %v2418_v13  }
  0x39   : > { %427 = vperm.xlu1 %2599, %v2417_v14  }
  0x3a   : > { %422 = vperm.xlu0 %2598, %v2416_v15  }
  0x40   : > { %494 = vperm.xlu2 %2600, %v2421_v16  }
  0x41   : > { %489 = vperm.xlu1 %2599, %v2420_v17   ;;  %v2483_v17 = vld [vmem:[%s2895_s25 + $0x4f] ss:$2 sm:$0xff] }
  0x42   : > { %484 = vperm.xlu0 %2598, %v2419_v18   ;;  %v2511_v18 = vld [vmem:[%s2895_s25 + $0x35] ss:$2 sm:$0xff] }
  0x48   : > { %509 = vperm.xlu2 %2600, %v2424_v19   ;;  %v2510_v19 = vld [vmem:[%s2895_s25 + $0x25] ss:$2 sm:$0xff] }
  0x49   : > { %504 = vperm.xlu1 %2599, %v2423_v20  }
  0x4a   : > { %499 = vperm.xlu0 %2598, %v2422_v21  }
  0x50   : > { %524 = vperm.xlu2 %2600, %v2427_v22  }
  0x51   : > { %519 = vperm.xlu1 %2599, %v2426_v23  }
  0x52   : > { %514 = vperm.xlu0 %2598, %v2425_v24  }
  0x58   : > { %539 = vperm.xlu2 %2600, %v2430_v25  }
  0x59   : > { %534 = vperm.xlu1 %2599, %v2429_v26   ;;  %v2525_v26 = vld [vmem:[%s2895_s25 + $0x28] ss:$2 sm:$0xff] }
  0x5a   : > { %529 = vperm.xlu0 %2598, %v2428_v27   ;;  %v2524_v27 = vld [vmem:[%s2895_s25 + $0x18] ss:$2 sm:$0xff] }
  0x60   : > { %554 = vperm.xlu2 %2600, %v2433_v28   ;;  %v2497_v28 = vld [vmem:[%s2895_s25 + $0x42] ss:$2 sm:$0xff] }
  0x61   : > { %549 = vperm.xlu1 %2599, %v2432_v29  }
  0x62   : > { %544 = vperm.xlu0 %2598, %v2431_v30  }
  0x68   : > { %631 = vperm.xlu2 %2600, %v2436_v31  }
  0x69   : > { %626 = vperm.xlu1 %2599, %v2435_v32  }
  0x6a   : > { %621 = vperm.xlu0 %2598, %v2434_v33  }
  0x70   : > { %646 = vperm.xlu2 %2600, %v2439_v34  }
  0x71   : > { %641 = vperm.xlu1 %2599, %v2438_v35   ;;  %v2498_v35 = vld [vmem:[%s2895_s25 + $0x52] ss:$2 sm:$0xff] }
  0x72   : > { %636 = vperm.xlu0 %2598, %v2437_v36   ;;  %v2933_v37 = vpop.permute.xlu2 %382  ;;  %v2454_v36 = vld [vmem:[%s2895_s25 + $0x59] ss:$2 sm:$0xff] }
  0x78   : > { %661 = vperm.xlu2 %2600, %v2442_v38   ;;  %v2526_v38 = vld [vmem:[%s2895_s25 + $0x38] ss:$2 sm:$0xff] }
  0x79   : > { %656 = vperm.xlu1 %2599, %v2441_v39  }
  0x7a   : > { %651 = vperm.xlu0 %2598, %v2440_v40   ;;  %v2938_v41 = vpop.permute.xlu2 %387 }
  0x80   : > { %768 = vperm.xlu2 %2600, %v2451_v42  }
  0x81   : > { %763 = vperm.xlu1 %2599, %v2450_v43  }
  0x82   : > { %758 = vperm.xlu0 %2598, %v2449_v44   ;;  %v403_v45 = vpop.permute.xlu2 %402 }
  0x83   : > { %v444_v13 = vmul.f32 %v2977_v9, %v403_v45 }
  0x88   : > { %905 = vperm.xlu2 %2600, %v2466_v46  }
  0x89   : > { %900 = vperm.xlu1 %2599, %v2465_v47  }
  0x8a   : > { %895 = vperm.xlu0 %2598, %v2464_v48   ;;  %v418_v49 = vpop.permute.xlu2 %417  ;;  %v2469_v48 = vld [vmem:[%s2895_s25 + $0x5c] ss:$2 sm:$0xff] }
  0x8b   : > { %v2946_v50 = vpop.permute.xlu1 %372  ;;  %v447_v22 = vmul.f32 %v2977_v9, %v418_v49  ;;  %v2455_v49 = vld [vmem:[%s2895_s25 + $0x69] ss:$2 sm:$0xff] }
  0x8c   : > { %v2948_v51 = vpop.permute.xlu0 %362 }
  0x90   : > { %1037 = vperm.xlu2 %2600, %v2480_v52  }
  0x91   : > { %1032 = vperm.xlu1 %2599, %v2479_v53   ;;  %v2512_v53 = vld [vmem:[%s2895_s25 + $0x45] ss:$2 sm:$0xff] }
  0x92   : > { %773 = vperm.xlu0 %2598, %v2452_v54   ;;  %v433_v55 = vpop.permute.xlu2 %432 }
  0x93   : > { %v2953_v56 = vpop.permute.xlu1 %377  ;;  %v450_v31 = vmul.f32 %v2977_v9, %v433_v55 }
  0x94   : > { %v2955_v57 = vpop.permute.xlu0 %367 }
  0x98   : > { %910 = vperm.xlu2 %2600, %v2467_v58  }
  0x99   : > { %778 = vperm.xlu1 %2599, %v2453_v59  }
  0x9a   : > { %1042 = vperm.xlu0 %2598, %v2481_v60   ;;  %v2960_v61 = vpop.permute.xlu2 %494 }
  0x9b   : > { %v398_v62 = vpop.permute.xlu1 %397 }
  0x9c   : > { %v393_v63 = vpop.permute.xlu0 %392  ;;  %v443_v42 = vmul.f32 %v2977_v9, %v398_v62 }
  0x9d   : > { %v442_v45 = vmul.f32 %v2977_v9, %v393_v63 }
  0xa0   : > { %1179 = vperm.xlu2 %2600, %v2496_v0  }
  0xa1   : > { %1174 = vperm.xlu1 %2599, %v2495_v1   ;;  %v2470_v1 = vld [vmem:[%s2895_s25 + $0x6c] ss:$2 sm:$0xff] }
  0xa2   : > { %1169 = vperm.xlu0 %2598, %v2494_v2   ;;  %v2965_v3 = vpop.permute.xlu2 %509  ;;  %v2527_v2 = vld [vmem:[%s2895_s25 + $0x48] ss:$2 sm:$0xff] }
  0xa3   : > { %v2967_v4 = vpop.permute.xlu1 %412 }
  0xa4   : > { %v2969_v5 = vpop.permute.xlu0 %407  ;;  %v446_v58 = vmul.f32 %v2977_v9, %v2967_v4  ;;  %v3048_v4 = vld [vmem:[%s3805_s1 + $0x2] ss:$0 sm:$0xff] }
  0xa5   : > { %v445_v62 = vmul.f32 %v2977_v9, %v2969_v5 }
  0xa8   : > { %1306 = vperm.xlu2 %2600, %v2509_v6  }
  0xa9   : > { %1047 = vperm.xlu1 %2599, %v2482_v7   ;;  %v2513_v7 = vld [vmem:[%s2895_s25 + $0x55] ss:$2 sm:$0xff] }
  0xaa   : > { %915 = vperm.xlu0 %2598, %v2468_v8   ;;  %v525_v11 = vpop.permute.xlu2 %524 }
  0xab   : > { %v2984_v12 = vpop.permute.xlu1 %427  ;;  %v566_v14 = vmul.f32 %v2982_v10, %v525_v11 }
  0xac   : > { %v2988_v15 = vpop.permute.xlu0 %422  ;;  %v449_v11 = vmul.f32 %v2977_v9, %v2984_v12  ;;  %v2528_v12 = vld [vmem:[%s2895_s25 + $0x58] ss:$2 sm:$0xff] }
  0xad   : > { %v2990_v16 = vadd.f32 %v566_v14, %v444_v13 }
  0xb0   : > { %1052 = vperm.xlu2 %2600, %v2483_v17  }
  0xb1   : > { %1316 = vperm.xlu1 %2599, %v2511_v18   ;;  %v448_v18 = vmul.f32 %v2977_v9, %v2988_v15 }
  0xb2   : > { %1311 = vperm.xlu0 %2598, %v2510_v19   ;;  %v540_v20 = vpop.permute.xlu2 %539 }
  0xb3   : > { %v2995_v21 = vpop.permute.xlu1 %489  ;;  %v569_v23 = vmul.f32 %v2982_v10, %v540_v20 }
  0xb4   : > { %v2999_v24 = vpop.permute.xlu0 %484 }
  0xb5   : > { %v3001_v25 = vadd.f32 %v569_v23, %v447_v22  ;;  %v2485_v23 = vld [vmem:[%s2895_s25 + $0x6f] ss:$2 sm:$0xff] }
  0xb8   : > { %1448 = vperm.xlu2 %2600, %v2525_v26  }
  0xb9   : > { %1443 = vperm.xlu1 %2599, %v2524_v27   ;;  %v2484_v27 = vld [vmem:[%s2895_s25 + $0x5f] ss:$2 sm:$0xff] }
  0xba   : > { %1184 = vperm.xlu0 %2598, %v2497_v28   ;;  %v555_v29 = vpop.permute.xlu2 %554 }
  0xbb   : > { %v3006_v30 = vpop.permute.xlu1 %504  ;;  %v572_v32 = vmul.f32 %v2982_v10, %v555_v29 }
  0xbc   : > { %v3010_v33 = vpop.permute.xlu0 %499 }
  0xbd   : > { %v3012_v34 = vadd.f32 %v572_v32, %v450_v31  ;;  %v2456_v31 = vld [vmem:[%s2895_s25 + $0x79] ss:$2 sm:$0xff]  ;;  %v2499_v32 = vld [vmem:[%s2895_s25 + $0x62] ss:$2 sm:$0xff] }
  0xc0   : > { %1189 = vperm.xlu2 %2600, %v2498_v35  }
  0xc1   : > { %783 = vperm.xlu1 %2599, %v2454_v36  }
  0xc2   : > { %1453 = vperm.xlu0 %2598, %v2526_v38   ;;  %v3017_v39 = vpop.permute.xlu2 %631 }
  0xc3   : > { %v520_v40 = vpop.permute.xlu1 %519 }
  0xc4   : > { %v565_v43 = vmul.f32 %v2982_v10, %v520_v40  ;;  %v515_v44 = vpop.permute.xlu0 %514  ;;  %v2471_v40 = vld [vmem:[%s2895_s25 + $0x7c] ss:$2 sm:$0xff] }
  0xc5   : > { %v564_v46 = vmul.f32 %v2982_v10, %v515_v44 }
  0xc6   : > { %v3023_v47 = vadd.f32 %v565_v43, %v443_v42  ;;  %v2457_v42 = vld [vmem:[%s2895_s25 + $0x89] ss:$2 sm:$0xff] }
  0xc7   : > { %v3027_v52 = vadd.f32 %v564_v46, %v442_v45  ;;  %v2514_v43 = vld [vmem:[%s2895_s25 + $0x65] ss:$2 sm:$0xff] }
  0xc8   : > { %920 = vperm.xlu2 %2600, %v2469_v48  }
  0xc9   : > { %788 = vperm.xlu1 %2599, %v2455_v49  }
  0xca   : > { %1321 = vperm.xlu0 %2598, %v2512_v53   ;;  %v3030_v54 = vpop.permute.xlu2 %646 }
  0xcb   : > { %v535_v55 = vpop.permute.xlu1 %534 }
  0xcc   : > { %v568_v59 = vmul.f32 %v2982_v10, %v535_v55  ;;  %v530_v60 = vpop.permute.xlu0 %529  ;;  %v2472_v55 = vld [vmem:[%s2895_s25 + $0x8c] ss:$2 sm:$0xff] }
  0xcd   : > { %v567_v63 = vmul.f32 %v2982_v10, %v530_v60  ;;  %v2515_v60 = vld [vmem:[%s2895_s25 + $0x75] ss:$2 sm:$0xff] }
  0xce   : > { %v3038_v0 = vadd.f32 %v568_v59, %v446_v58  ;;  %v2529_v58 = vld [vmem:[%s2895_s25 + $0x68] ss:$2 sm:$0xff] }
  0xcf   : > { %v3042_v6 = vadd.f32 %v567_v63, %v445_v62 }
  0xd0   : > { %925 = vperm.xlu2 %2600, %v2470_v1  }
  0xd1   : > { %1458 = vperm.xlu1 %2599, %v2527_v2   ;;  %v2443_v2 = vld [vmem:[%s2895_s25 + $0x96] ss:$2 sm:$0xff] }
  0xd2   : > { %1326 = vperm.xlu0 %2598, %v2513_v7   ;;  %v662_v5 = vpop.permute.xlu2 %661  ;;  %v2530_v7 = vld [vmem:[%s2895_s25 + $0x78] ss:$2 sm:$0xff] }
  0xd3   : > { %v550_v8 = vpop.permute.xlu1 %549  ;;  %v703_v13 = vmul.f32 %v3048_v4, %v662_v5 }
  0xd4   : > { %v571_v14 = vmul.f32 %v2982_v10, %v550_v8  ;;  %v545_v17 = vpop.permute.xlu0 %544 }
  0xd5   : > { %v570_v19 = vmul.f32 %v2982_v10, %v545_v17  ;;  %v3058_v20 = vadd.f32 %v703_v13, %v2990_v16  ;;  %v2500_v16 = vld [vmem:[%s2895_s25 + $0x72] ss:$2 sm:$0xff]  ;;  %v2501_v13 = vld [vmem:[%s2895_s25 + $0x82] ss:$2 sm:$0xff] }
  0xd6   : > { %v3060_v22 = vadd.f32 %v571_v14, %v449_v11  ;;  %v2444_v11 = vld [vmem:[%s2895_s25 + $0xa6] ss:$2 sm:$0xff]  ;;  %v2487_v14 = vld [vmem:[%s2895_s25 + $0x8f] ss:$2 sm:$0xff] }
  0xd7   : > { %v3064_v26 = vadd.f32 %v570_v19, %v448_v18 }
  0xd8   : > { %1062 = vperm.xlu2 %2600, %v2485_v23   ;;  %v2516_v23 = vld [vmem:[%s2895_s25 + $0x85] ss:$2 sm:$0xff] }
  0xd9   : > { %1463 = vperm.xlu1 %2599, %v2528_v12   ;;  %v2502_v12 = vld [vmem:[%s2895_s25 + $0x92] ss:$2 sm:$0xff] }
  0xda   : > { %1057 = vperm.xlu0 %2598, %v2484_v27   ;;  %v3067_v15 = vpop.permute.xlu2 %768  ;;  %v2458_v27 = vld [vmem:[%s2895_s25 + $0x99] ss:$2 sm:$0xff] }
  0xdb   : > { %v3069_v28 = vpop.permute.xlu1 %626 }
  0xdc   : > { %v3071_v29 = vpop.permute.xlu0 %621 }
  0xe0   : > { %1199 = vperm.xlu2 %2600, %v2500_v16  }
  0xe1   : > { %793 = vperm.xlu1 %2599, %v2456_v31  }
  0xe2   : > { %1194 = vperm.xlu0 %2598, %v2499_v32   ;;  %v3076_v35 = vpop.permute.xlu2 %905 }
  0xe3   : > { %v3078_v36 = vpop.permute.xlu1 %641 }
  0xe4   : > { %v3080_v38 = vpop.permute.xlu0 %636 }
  0xe8   : > { %930 = vperm.xlu2 %2600, %v2471_v40   ;;  %v2517_v40 = vld [vmem:[%s2895_s25 + $0x95] ss:$2 sm:$0xff] }
  0xe9   : > { %798 = vperm.xlu1 %2599, %v2457_v42   ;;  %v2473_v42 = vld [vmem:[%s2895_s25 + $0x9c] ss:$2 sm:$0xff] }
  0xea   : > { %1331 = vperm.xlu0 %2598, %v2514_v43   ;;  %v3085_v44 = vpop.permute.xlu2 %1037  ;;  %v2459_v43 = vld [vmem:[%s2895_s25 + $0xa9] ss:$2 sm:$0xff] }
  0xeb   : > { %v657_v45 = vpop.permute.xlu1 %656 }
  0xec   : > { %v702_v46 = vmul.f32 %v3048_v4, %v657_v45  ;;  %v652_v48 = vpop.permute.xlu0 %651 }
  0xed   : > { %v701_v49 = vmul.f32 %v3048_v4, %v652_v48 }
  0xee   : > { %v3090_v53 = vadd.f32 %v702_v46, %v3023_v47  ;;  %v2486_v47 = vld [vmem:[%s2895_s25 + $0x7f] ss:$2 sm:$0xff] }
  0xef   : > { %v3095_v59 = vadd.f32 %v701_v49, %v3027_v52  ;;  %v559_v49 = vmul.f32 %v2982_v10, %v2995_v21 }
  0xf0   : > { %935 = vperm.xlu2 %2600, %v2472_v55   ;;  %v2488_v55 = vld [vmem:[%s2895_s25 + $0x9f] ss:$2 sm:$0xff] }
  0xf1   : > { %1468 = vperm.xlu1 %2599, %v2529_v58   ;;  %v2474_v58 = vld [vmem:[%s2895_s25 + $0xac] ss:$2 sm:$0xff] }
  0xf2   : > { %1336 = vperm.xlu0 %2598, %v2515_v60   ;;  %v3098_v62 = vpop.permute.xlu2 %910  ;;  %v437_v60 = vmul.f32 %v2977_v9, %v2955_v57  ;;  %v558_v57 = vmul.f32 %v2982_v10, %v2999_v24  ;;  %v3160_v24 = vld [vmem:[%s3805_s1 + $0x5] ss:$0 sm:$0xff] }
  0xf3   : > { %v764_v63 = vpop.permute.xlu1 %763 }
  0xf4   : > { %v759_v1 = vpop.permute.xlu0 %758 }
  0xf8   : > { %666 = vperm.xlu2 %2600, %v2443_v2   ;;  %v3133_v2 = vld [vmem:[%s3805_s1 + $0x3] ss:$0 sm:$0xff] }
  0xf9   : > { %1473 = vperm.xlu1 %2599, %v2530_v7   ;;  %v696_v7 = vmul.f32 %v3048_v4, %v3069_v28  ;;  %v833_v21 = vmul.f32 %v3133_v2, %v764_v63  ;;  %v695_v63 = vmul.f32 %v3048_v4, %v3071_v29  ;;  %v2532_v29 = vld [vmem:[%s2895_s25 + $0x98] ss:$2 sm:$0xff] }
  0xfa   : > { %1067 = vperm.xlu0 %2598, %v2486_v47   ;;  %v3103_v52 = vpop.permute.xlu2 %1179  ;;  %v2531_v47 = vld [vmem:[%s2895_s25 + $0x88] ss:$2 sm:$0xff] }
  0xfb   : > { %v901_v5 = vpop.permute.xlu1 %900 }
  0xfc   : > { %v896_v8 = vpop.permute.xlu0 %895 }
 0x100   : > { %671 = vperm.xlu2 %2600, %v2444_v11   ;;  %v574_v11 = vadd.f32 %v559_v49, %v437_v60  ;;  %v2489_v49 = vld [vmem:[%s2895_s25 + $0xaf] ss:$2 sm:$0xff] }
 0x101   : > { %1204 = vperm.xlu1 %2599, %v2501_v13   ;;  %v3141_v13 = vld [vmem:[%s3805_s1 + $0x4] ss:$0 sm:$0xff] }
 0x102   : > { %1072 = vperm.xlu0 %2598, %v2487_v14   ;;  %v3108_v17 = vpop.permute.xlu2 %1306  ;;  %v711_v14 = vadd.f32 %v696_v7, %v574_v11  ;;  %v970_v28 = vmul.f32 %v3141_v13, %v901_v5  ;;  %v832_v5 = vmul.f32 %v3133_v2, %v759_v1  ;;  %v969_v7 = vmul.f32 %v3141_v13, %v896_v8  ;;  %v3181_v8 = vld [vmem:[%s3805_s1 + $0x7] ss:$0 sm:$0xff] }
 0x103   : > { %v1033_v18 = vpop.permute.xlu1 %1032 }
 0x104   : > { %v3110_v19 = vpop.permute.xlu0 %773 }
 0x108   : > { %1341 = vperm.xlu2 %2600, %v2516_v23  }
 0x109   : > { %1209 = vperm.xlu1 %2599, %v2502_v12  }
 0x10a   : > { %803 = vperm.xlu0 %2598, %v2458_v27   ;;  %v3115_v16 = vpop.permute.xlu2 %1052  ;;  %v436_v27 = vmul.f32 %v2977_v9, %v2948_v51  ;;  %v3168_v51 = vld [vmem:[%s3805_s1 + $0x6] ss:$0 sm:$0xff] }
 0x10b   : > { %v3117_v31 = vpop.permute.xlu1 %778 }
 0x10c   : > { %v3119_v32 = vpop.permute.xlu0 %1042 }
 0x110   : > { %1346 = vperm.xlu2 %2600, %v2517_v40  }
 0x111   : > { %940 = vperm.xlu1 %2599, %v2473_v42   ;;  %v848_v42 = vadd.f32 %v833_v21, %v711_v14  ;;  %v1106_v21 = vmul.f32 %v3160_v24, %v1033_v18 }
 0x112   : > { %808 = vperm.xlu0 %2598, %v2459_v43   ;;  %v1449_v45 = vpop.permute.xlu2 %1448  ;;  %v573_v43 = vadd.f32 %v558_v57, %v436_v27  ;;  %v560_v57 = vmul.f32 %v2982_v10, %v2960_v61  ;;  %v438_v61 = vmul.f32 %v2977_v9, %v2946_v50 }
 0x113   : > { %v1175_v46 = vpop.permute.xlu1 %1174 }
 0x114   : > { %v1170_v48 = vpop.permute.xlu0 %1169  ;;  %v710_v60 = vadd.f32 %v695_v63, %v573_v43  ;;  %v1244_v11 = vmul.f32 %v3168_v51, %v1175_v46 }
 0x115   : > { %v1243_v27 = vmul.f32 %v3168_v51, %v1170_v48  ;;  %v3204_v48 = vld [vmem:[%s3806_s2] ss:$0 sm:$0xff] }
 0x116   : > { %v847_v1 = vadd.f32 %v832_v5, %v710_v60  ;;  %v834_v60 = vmul.f32 %v3133_v2, %v3067_v15  ;;  %v1380_v15 = vmul.f32 %v3181_v8, %v3108_v17  ;;  %v2461_v17 = vld [vmem:[%s2895_s25 + $0xc9] ss:$2 sm:$0xff] }
 0x118   : > { %1077 = vperm.xlu2 %2600, %v2488_v55   ;;  %v2445_v55 = vld [vmem:[%s2895_s25 + $0xb6] ss:$2 sm:$0xff] }
 0x119   : > { %945 = vperm.xlu1 %2599, %v2474_v58   ;;  %v985_v58 = vadd.f32 %v970_v28, %v848_v42  ;;  %v984_v28 = vadd.f32 %v969_v7, %v847_v1  ;;  %v697_v42 = vmul.f32 %v3048_v4, %v3017_v39  ;;  %v971_v1 = vmul.f32 %v3141_v13, %v3076_v35 }
 0x11a   : > { %1478 = vperm.xlu0 %2598, %v2531_v47   ;;  %v3147_v23 = vpop.permute.xlu2 %1189  ;;  %v1107_v47 = vmul.f32 %v3160_v24, %v3085_v44  ;;  %v3186_v44 = vld [vmem:[%s3805_s1 + $0x8] ss:$0 sm:$0xff] }
 0x11b   : > { %v3149_v12 = vpop.permute.xlu1 %1047  ;;  %v1518_v7 = vmul.f32 %v3186_v44, %v1449_v45 }
 0x11c   : > { %v3155_v40 = vpop.permute.xlu0 %915  ;;  %v1122_v46 = vadd.f32 %v1107_v47, %v985_v58  ;;  %v2446_v58 = vld [vmem:[%s2895_s25 + $0xc6] ss:$2 sm:$0xff] }
 0x11d   : > { %v2503_v47 = vld [vmem:[%s2895_s25 + $0xa2] ss:$2 sm:$0xff] }
 0x11e   : > { %v1259_v43 = vadd.f32 %v1244_v11, %v1122_v46 }
 0x120   : > { %1082 = vperm.xlu2 %2600, %v2489_v49   ;;  %v1121_v49 = vadd.f32 %v1106_v21, %v984_v28 }
 0x121   : > { %676 = vperm.xlu1 %2599, %v2445_v55   ;;  %v2460_v55 = vld [vmem:[%s2895_s25 + $0xb9] ss:$2 sm:$0xff] }
 0x122   : > { %1483 = vperm.xlu0 %2598, %v2532_v29   ;;  %v3188_v14 = vpop.permute.xlu2 %920  ;;  %v575_v29 = vadd.f32 %v560_v57, %v438_v61  ;;  %v1258_v39 = vadd.f32 %v1243_v27, %v1121_v49  ;;  %v1108_v57 = vmul.f32 %v3160_v24, %v3119_v32  ;;  %v2518_v49 = vld [vmem:[%s2895_s25 + $0xa5] ss:$2 sm:$0xff] }
 0x123   : > { %v1317_v18 = vpop.permute.xlu1 %1316 }
 0x124   : > { %v1312_v63 = vpop.permute.xlu0 %1311  ;;  %v712_v11 = vadd.f32 %v697_v42, %v575_v29  ;;  %v1395_v35 = vadd.f32 %v1380_v15, %v1258_v39  ;;  %v1245_v29 = vmul.f32 %v3168_v51, %v3103_v52  ;;  %v439_v52 = vmul.f32 %v2977_v9, %v2953_v56  ;;  %v1938_v56 = vld [vmem:[%s3807_s3 + $0x88] sm:$0xff] }
 0x125   : > { %v1381_v5 = vmul.f32 %v3181_v8, %v1312_v63  ;;  %2010 = vmatpush.msra.mxu1 %v1938_v56  ;;  %v2447_v56 = vld [vmem:[%s2895_s25 + $0xd6] ss:$2 sm:$0xff] }
 0x126   : > { %v849_v45 = vadd.f32 %v834_v60, %v712_v11  ;;  %v1382_v60 = vmul.f32 %v3181_v8, %v1317_v18  ;;  %v698_v18 = vmul.f32 %v3048_v4, %v3080_v38  ;;  %v562_v38 = vmul.f32 %v2982_v10, %v3006_v30 }
 0x127   : > { %v1396_v50 = vadd.f32 %v1381_v5, %v1259_v43 }
 0x128   : > { %813 = vperm.xlu2 %2600, %v2460_v55   ;;  %v986_v42 = vadd.f32 %v971_v1, %v849_v45  ;;  %v835_v45 = vmul.f32 %v3133_v2, %v3110_v19  ;;  %v440_v19 = vmul.f32 %v2977_v9, %v2933_v37  ;;  %v972_v37 = vmul.f32 %v3141_v13, %v3098_v62 }
 0x129   : > { %v1533_v21 = vadd.f32 %v1518_v7, %v1396_v50  ;;  %681 = vperm.xlu1 %2599, %v2446_v58   ;;  %v2504_v58 = vld [vmem:[%s2895_s25 + $0xb2] ss:$2 sm:$0xff]  ;;  %v561_v7 = vmul.f32 %v2982_v10, %v3010_v33 }
 0x12a   : > { %1214 = vperm.xlu0 %2598, %v2503_v47   ;;  %v3214_v28 = vpop.permute.xlu2 %925  ;;  %v1123_v55 = vadd.f32 %v1108_v57, %v986_v42  ;;  %v2533_v57 = vld [vmem:[%s2895_s25 + $0xa8] ss:$2 sm:$0xff] }
 0x12b   : > { %v1552_v46 = vadd.f32 %v3204_v48, %v1533_v21  ;;  %v1444_v27 = vpop.permute.xlu1 %1443  ;;  %v576_v15 = vadd.f32 %v561_v7, %v439_v52  ;;  %v2534_v52 = vld [vmem:[%s2895_s25 + $0xb8] ss:$2 sm:$0xff] }
 0x12c   : > { %v1517_v63 = vmul.f32 %v3186_v44, %v1444_v27  ;;  %v1185_v61 = vpop.permute.xlu0 %1184  ;;  %v1260_v47 = vadd.f32 %v1245_v29, %v1123_v55 }
 0x12d   : > { %v1567_v43 = vmax.f32 %v1552_v46, 0.0  ;;  %v2519_v46 = vld [vmem:[%s2895_s25 + $0xb5] ss:$2 sm:$0xff] }
 0x12e   : > { %v1532_v5 = vadd.f32 %v1517_v63, %v1395_v35  ;;  %v1397_v21 = vadd.f32 %v1382_v60, %v1260_v47  ;;  %v2475_v35 = vld [vmem:[%s2895_s25 + $0xbc] ss:$2 sm:$0xff]  ;;  %v713_v63 = vadd.f32 %v698_v18, %v576_v15  ;;  %v1246_v47 = vmul.f32 %v3168_v51, %v1185_v61  ;;  %v2490_v18 = vld [vmem:[%s2895_s25 + $0xbf] ss:$2 sm:$0xff] }
 0x12f   : > { %1583 = vst.msk [vmem:[#allocation2 + $0x8] sm:$0xff] %vm1581_vm0, %v1567_v43  ;;  %v699_v43 = vmul.f32 %v3048_v4, %v3078_v36  ;;  %v836_v36 = vmul.f32 %v3133_v2, %v3117_v31  ;;  %v1110_v61 = vmul.f32 %v3160_v24, %v3115_v16 }
 0x130   : > { %v1551_v32 = vadd.f32 %v3204_v48, %v1532_v5  ;;  %818 = vperm.xlu2 %2600, %v2461_v17   ;;  %v850_v5 = vadd.f32 %v835_v45, %v713_v63  ;;  %v1937_v17 = vld [vmem:[%s3807_s3 + $0x80] sm:$0xff]  ;;  %v2491_v63 = vld [vmem:[%s2895_s25 + $0xcf] ss:$2 sm:$0xff] }
 0x131   : > { %1351 = vperm.xlu1 %2599, %v2518_v49   ;;  %2011 = vmatpush.msra.mxu1 %v1937_v17 }
 0x132   : > { %v1566_v50 = vmax.f32 %v1551_v32, 0.0  ;;  %1219 = vperm.xlu0 %2598, %v2504_v58   ;;  %v3227_v39 = vpop.permute.xlu2 %1062  ;;  %v577_v58 = vadd.f32 %v562_v38, %v440_v19  ;;  %v1109_v32 = vmul.f32 %v3160_v24, %v3149_v12  ;;  %v987_v7 = vadd.f32 %v972_v37, %v850_v5  ;;  %v2505_v38 = vld [vmem:[%s2895_s25 + $0xc2] ss:$2 sm:$0xff] }
 0x133   : > { %v3229_v11 = vpop.permute.xlu1 %783 }
 0x134   : > { %1582 = vst.msk [vmem:[#allocation2] sm:$0xff] %vm1581_vm0, %v1566_v50  ;;  %v1454_v1 = vpop.permute.xlu0 %1453  ;;  %v714_v60 = vadd.f32 %v699_v43, %v577_v58  ;;  %v973_v50 = vmul.f32 %v3141_v13, %v3155_v40 }
 0x135   : > { %v1519_v33 = vmul.f32 %v3186_v44, %v1454_v1  ;;  %v2476_v1 = vld [vmem:[%s2895_s25 + $0xcc] ss:$2 sm:$0xff] }
 0x136   : > { %v851_v62 = vadd.f32 %v836_v36, %v714_v60  ;;  %v2506_v60 = vld [vmem:[%s2895_s25 + $0xd2] ss:$2 sm:$0xff] }
 0x137   : > { %v1534_v27 = vadd.f32 %v1519_v33, %v1397_v21  ;;  %v1124_v21 = vadd.f32 %v1109_v32, %v987_v7  ;;  %v2462_v32 = vld [vmem:[%s2895_s25 + $0xd9] ss:$2 sm:$0xff] }
 0x138   : > { %1488 = vperm.xlu2 %2600, %v2533_v57   ;;  %v988_v12 = vadd.f32 %v973_v50, %v851_v62  ;;  %v563_v50 = vmul.f32 %v2982_v10, %v2965_v3  ;;  %v700_v62 = vmul.f32 %v3048_v4, %v3030_v54  ;;  %v2477_v3 = vld [vmem:[%s2895_s25 + $0xdc] ss:$2 sm:$0xff] }
 0x139   : > { %v1553_v42 = vadd.f32 %v3204_v48, %v1534_v27  ;;  %1356 = vperm.xlu1 %2599, %v2519_v46   ;;  %v1261_v33 = vadd.f32 %v1246_v47, %v1124_v21  ;;  %v2535_v10 = vld [vmem:[%s2895_s25 + $0xc8] ss:$2 sm:$0xff] }
 0x13a   : > { %950 = vperm.xlu0 %2598, %v2475_v35   ;;  %v3255_v49 = vpop.permute.xlu2 %1199  ;;  %v1125_v27 = vadd.f32 %v1110_v61, %v988_v12  ;;  %v837_v12 = vmul.f32 %v3133_v2, %v3229_v11  ;;  %v974_v11 = vmul.f32 %v3141_v13, %v3188_v14 }
 0x13b   : > { %v1568_v30 = vmax.f32 %v1553_v42, 0.0  ;;  %v3257_v55 = vpop.permute.xlu1 %788  ;;  %v1247_v42 = vmul.f32 %v3168_v51, %v3147_v23 }
 0x13c   : > { %v1322_v29 = vpop.permute.xlu0 %1321 }
 0x13d   : > { %1584 = vst.msk [vmem:[#allocation2 + $0x10] sm:$0xff] %vm1581_vm0, %v1568_v30  ;;  %v1383_v31 = vmul.f32 %v3181_v8, %v1322_v29  ;;  %v1262_v5 = vadd.f32 %v1247_v42, %v1125_v27  ;;  %v2520_v29 = vld [vmem:[%s2895_s25 + $0xc5] ss:$2 sm:$0xff]  ;;  %v975_v42 = vmul.f32 %v3141_v13, %v3214_v28 }
 0x13f   : > { %v1398_v45 = vadd.f32 %v1383_v31, %v1261_v33  ;;  %v2521_v33 = vld [vmem:[%s2895_s25 + $0xd5] ss:$2 sm:$0xff] }
 0x140   : > { %1493 = vperm.xlu2 %2600, %v2534_v52  }
 0x141   : > { %1087 = vperm.xlu1 %2599, %v2490_v18  }
 0x142   : > { %955 = vperm.xlu0 %2598, %v2476_v1   ;;  %v3273_v15 = vpop.permute.xlu2 %930  ;;  %v441_v1 = vmul.f32 %v2977_v9, %v2938_v41  ;;  %v838_v9 = vmul.f32 %v3133_v2, %v3257_v55  ;;  %v2507_v55 = vld [vmem:[%s2895_s25 + $0xe2] ss:$2 sm:$0xff] }
 0x143   : > { %v1459_v40 = vpop.permute.xlu1 %1458 }
 0x144   : > { %v1520_v57 = vmul.f32 %v3186_v44, %v1459_v40  ;;  %v1327_v46 = vpop.permute.xlu0 %1326  ;;  %v578_v31 = vadd.f32 %v563_v50, %v441_v1  ;;  %v853_v27 = vadd.f32 %v838_v9, %v3095_v59 }
 0x145   : > { %v1384_v43 = vmul.f32 %v3181_v8, %v1327_v46 }
 0x146   : > { %v1535_v35 = vadd.f32 %v1520_v57, %v1398_v45  ;;  %v715_v40 = vadd.f32 %v700_v62, %v578_v31 }
 0x147   : > { %v1399_v58 = vadd.f32 %v1384_v43, %v1262_v5  ;;  %v990_v43 = vadd.f32 %v975_v42, %v853_v27  ;;  %v1112_v5 = vmul.f32 %v3160_v24, %v3227_v39 }
 0x148   : > { %v1554_v19 = vadd.f32 %v3204_v48, %v1535_v35  ;;  %686 = vperm.xlu2 %2600, %v2447_v56   ;;  %v852_v41 = vadd.f32 %v837_v12, %v715_v40 }
 0x149   : > { %1224 = vperm.xlu1 %2599, %v2505_v38   ;;  %v2492_v38 = vld [vmem:[%s2895_s25 + $0xdf] ss:$2 sm:$0xff] }
 0x14a   : > { %v1569_v16 = vmax.f32 %v1554_v19, 0.0  ;;  %1092 = vperm.xlu0 %2598, %v2491_v63   ;;  %v3285_v17 = vpop.permute.xlu2 %935  ;;  %v989_v35 = vadd.f32 %v974_v11, %v852_v41  ;;  %v2536_v63 = vld [vmem:[%s2895_s25 + $0xd8] ss:$2 sm:$0xff]  ;;  %v1634_v41 = vld [vmem:[#allocation2 + $0x9] ss:$2 sm:$0xff] }
 0x14b   : > { %v1464_v30 = vpop.permute.xlu1 %1463  ;;  %v1622_v11 = vld [vmem:[#allocation2 + $0x6] ss:$2 sm:$0xff] }
 0x14c   : > { %1585 = vst.msk [vmem:[#allocation2 + $0x18] sm:$0xff] %vm1581_vm0, %v1569_v16  ;;  %v1521_v37 = vmul.f32 %v3186_v44, %v1464_v30  ;;  %v1058_v23 = vpop.permute.xlu0 %1057 }
 0x14d   : > { %v1111_v57 = vmul.f32 %v3160_v24, %v1058_v23 }
 0x14e   : > { %v1536_v36 = vadd.f32 %v1521_v37, %v1399_v58 }
 0x14f   : > { %v1126_v19 = vadd.f32 %v1111_v57, %v989_v35 }
 0x150   : > { %v1555_v7 = vadd.f32 %v3204_v48, %v1536_v36  ;;  %823 = vperm.xlu2 %2600, %v2462_v32   ;;  %v1127_v32 = vadd.f32 %v1112_v5, %v990_v43 }
 0x151   : > { %1361 = vperm.xlu1 %2599, %v2520_v29   ;;  %v2537_v29 = vld [vmem:[%s2895_s25 + $0xe8] ss:$2 sm:$0xff] }
 0x152   : > { %v1570_v47 = vmax.f32 %v1555_v7, 0.0  ;;  %1229 = vperm.xlu0 %2598, %v2506_v60   ;;  %v3295_v52 = vpop.permute.xlu2 %666  ;;  %v1610_v60 = vld [vmem:[#allocation2 + $0x3] ss:$2 sm:$0xff] }
 0x153   : > { %v3297_v18 = vpop.permute.xlu1 %793  ;;  %v2522_v7 = vld [vmem:[%s2895_s25 + $0xe5] ss:$2 sm:$0xff] }
 0x154   : > { %1586 = vst.msk [vmem:[#allocation2 + $0x20] sm:$0xff] %vm1581_vm0, %v1570_v47  ;;  %v1195_v21 = vpop.permute.xlu0 %1194  ;;  %v1249_v47 = vmul.f32 %v3168_v51, %v3255_v49 }
 0x155   : > { %v1248_v56 = vmul.f32 %v3168_v51, %v1195_v21 }
 0x156   : > { %v1264_v21 = vadd.f32 %v1249_v47, %v1127_v32 }
 0x157   : > { %v1263_v16 = vadd.f32 %v1248_v56, %v1126_v19  ;;  %v1646_v56 = vld [vmem:[#allocation2 + $0xc] ss:$2 sm:$0xff]  ;;  %v1658_v19 = vld [vmem:[#allocation2 + $0xf] ss:$2 sm:$0xff] }
 0x158   : > { %960 = vperm.xlu2 %2600, %v2477_v3  }
 0x159   : > { %1498 = vperm.xlu1 %2599, %v2535_v10  }
 0x15a   : > { %1366 = vperm.xlu0 %2598, %v2521_v33   ;;  %v3311_v54 = vpop.permute.xlu2 %671 }
 0x15b   : > { %v3313_v61 = vpop.permute.xlu1 %798  ;;  %v1694_v45 = vld [vmem:[#allocation2 + $0x18] ss:$2 sm:$0xff]  ;;  %v1612_v23 = vld [vmem:[#allocation2 + $0x13] ss:$2 sm:$0xff] }
 0x15c   : > { %v1332_v46 = vpop.permute.xlu0 %1331  ;;  %2539 = vmatmul.msk.f32.vlgmr.msra.gmra.mxu1 %vm1581_vm0, %v1694_v45  ;;  %v2601_v50 = vpack.i.bf16 %v1612_v23, %v1610_v60  ;;  %v1636_v33 = vld [vmem:[#allocation2 + $0x19] ss:$2 sm:$0xff]  ;;  %v1624_v49 = vld [vmem:[#allocation2 + $0x16] ss:$2 sm:$0xff] }
 0x15d   : > { %v1385_v14 = vmul.f32 %v3181_v8, %v1332_v46  ;;  %v2611_v45 = vpack.i.bf16 %v1636_v33, %v1634_v41  ;;  %v2606_v46 = vpack.i.bf16 %v1624_v49, %v1622_v11 }
 0x15f   : > { %v1400_v30 = vadd.f32 %v1385_v14, %v1263_v16  ;;  %v1682_v16 = vld [vmem:[#allocation2 + $0x15] ss:$2 sm:$0xff] }
 0x160   : > { %1234 = vperm.xlu2 %2600, %v2507_v55  }
 0x161   : > { %1097 = vperm.xlu1 %2599, %v2492_v38  }
 0x162   : > { %1503 = vperm.xlu0 %2598, %v2536_v63   ;;  %v3330_v28 = vpop.permute.xlu2 %1341 }
 0x163   : > { %v1469_v59 = vpop.permute.xlu1 %1468 }
 0x164   : > { %v1522_v58 = vmul.f32 %v3186_v44, %v1469_v59  ;;  %v1337_v37 = vpop.permute.xlu0 %1336  ;;  %v1670_v59 = vld [vmem:[#allocation2 + $0x12] ss:$2 sm:$0xff] }
 0x165   : > { %v1386_v39 = vmul.f32 %v3181_v8, %v1337_v37 }
 0x166   : > { %v1537_v36 = vadd.f32 %v1522_v58, %v1400_v30 }
 0x167   : > { %v1401_v12 = vadd.f32 %v1386_v39, %v1264_v21 }
 0x168   : > { %v1556_v1 = vadd.f32 %v3204_v48, %v1537_v36  ;;  %2602 = vrot.lane.b32.xlu2 %v2601_v50, %s3817_s28 }
 0x169   : > { %1508 = vperm.xlu1 %2599, %v2537_v29   ;;  %v839_v29 = vmul.f32 %v3133_v2, %v3297_v18  ;;  %v840_v18 = vmul.f32 %v3133_v2, %v3313_v61 }
 0x16a   : > { %v1571_v62 = vmax.f32 %v1556_v1, 0.0  ;;  %1371 = vperm.xlu0 %2598, %v2522_v7   ;;  %v3341_v9 = vpop.permute.xlu2 %1346  ;;  %v976_v7 = vmul.f32 %v3141_v13, %v3273_v15  ;;  %v1387_v15 = vmul.f32 %v3181_v8, %v3330_v28 }
 0x16b   : > { %v1474_v31 = vpop.permute.xlu1 %1473  ;;  %v854_v60 = vadd.f32 %v839_v29, %v3090_v53  ;;  %v977_v53 = vmul.f32 %v3141_v13, %v3285_v17  ;;  %v1388_v28 = vmul.f32 %v3181_v8, %v3341_v9 }
 0x16c   : > { %1587 = vst.msk [vmem:[#allocation2 + $0x28] sm:$0xff] %vm1581_vm0, %v1571_v62  ;;  %v1523_v3 = vmul.f32 %v3186_v44, %v1474_v31  ;;  %v1068_v10 = vpop.permute.xlu0 %1067 }
 0x16d   : > { %v1113_v50 = vmul.f32 %v3160_v24, %v1068_v10  ;;  %v991_v62 = vadd.f32 %v976_v7, %v854_v60 }
 0x16e   : > { %v1538_v40 = vadd.f32 %v1523_v3, %v1401_v12  ;;  %v855_v12 = vadd.f32 %v840_v18, %v3058_v20 }
 0x16f   : > { %v1128_v31 = vadd.f32 %v1113_v50, %v991_v62 }
 0x170   : > { %v1557_v57 = vadd.f32 %v3204_v48, %v1538_v40  ;;  %v992_v40 = vadd.f32 %v977_v53, %v855_v12 }
 0x171   : > { %2612 = vrot.lane.b32.xlu1 %v2611_v45, %s3816_s29 }
 0x172   : > { %v1572_v27 = vmax.f32 %v1557_v57, 0.0  ;;  %2607 = vrot.lane.b32.xlu0 %v2606_v46, %s3814_s14  ;;  %v3348_v43 = vpop.permute.xlu2 %1077 }
 0x173   : > { %v1205_v35 = vpop.permute.xlu1 %1204  ;;  %v1648_v55 = vld [vmem:[#allocation2 + $0x1c] ss:$2 sm:$0xff]  ;;  %v1660_v42 = vld [vmem:[#allocation2 + $0x1f] ss:$2 sm:$0xff] }
 0x174   : > { %1588 = vst.msk [vmem:[#allocation2 + $0x30] sm:$0xff] %vm1581_vm0, %v1572_v27  ;;  %v1073_v38 = vpop.permute.xlu0 %1072  ;;  %v2616_v63 = vpack.i.bf16 %v1648_v55, %v1646_v56  ;;  %v2621_v14 = vpack.i.bf16 %v1660_v42, %v1658_v19  ;;  %v1250_v21 = vmul.f32 %v3168_v51, %v1205_v35 }
 0x175   : > { %v1114_v10 = vmul.f32 %v3160_v24, %v1073_v38 }
 0x176   : > { %2617 = vrot.lane.b32.xlu2 %v2616_v63, %s2788_s16  ;;  %v1265_v3 = vadd.f32 %v1250_v21, %v1128_v31  ;;  %v704_v63 = vmul.f32 %v3048_v4, %v3295_v52  ;;  %v705_v52 = vmul.f32 %v3048_v4, %v3311_v54 }
 0x177   : > { %v1129_v20 = vadd.f32 %v1114_v10, %v992_v40 }
 0x178   : > { %v1402_v45 = vadd.f32 %v1387_v15, %v1265_v3  ;;  %v719_v9 = vadd.f32 %v704_v63, %v3042_v6  ;;  %v720_v60 = vadd.f32 %v705_v52, %v3038_v0 }
 0x17a   : > { %2622 = vrot.lane.b32.xlu0 %v2621_v14, %s2789_s17  ;;  %v3360_v47 = vpop.permute.xlu2 %1082 }
 0x17b   : > { %v1210_v5 = vpop.permute.xlu1 %1209  ;;  %v1696_v30 = vld [vmem:[#allocation2 + $0x28] ss:$2 sm:$0xff]  ;;  %v1684_v58 = vld [vmem:[#allocation2 + $0x25] ss:$2 sm:$0xff] }
 0x17c   : > { %v1672_v37 = vld [vmem:[#allocation2 + $0x22] ss:$2 sm:$0xff]  ;;  %v804_v23 = vpop.permute.xlu0 %803  ;;  %2540 = vmatmul.msk.f32.gmra.mxu1 %vm1581_vm0, %v1696_v30  ;;  %v2631_v36 = vpack.i.bf16 %v1684_v58, %v1682_v16  ;;  %v1251_v61 = vmul.f32 %v3168_v51, %v1210_v5  ;;  %v1638_v18 = vld [vmem:[#allocation2 + $0x29] ss:$2 sm:$0xff] }
 0x17d   : > { %v2626_v32 = vpack.i.bf16 %v1672_v37, %v1670_v59  ;;  %v841_v14 = vmul.f32 %v3133_v2, %v804_v23  ;;  %v1115_v23 = vmul.f32 %v3160_v24, %v3348_v43  ;;  %v1626_v62 = vld [vmem:[#allocation2 + $0x26] ss:$2 sm:$0xff]  ;;  %v1614_v10 = vld [vmem:[#allocation2 + $0x23] ss:$2 sm:$0xff] }
 0x17e   : > { %2632 = vrot.lane.b32.xlu2 %v2631_v36, %s2790_s21  ;;  %v1266_v46 = vadd.f32 %v1251_v61, %v1129_v20 }
 0x17f   : > { %2627 = vrot.lane.b32.xlu1 %v2626_v32, %s3818_s22  ;;  %v856_v58 = vadd.f32 %v841_v14, %v719_v9 }
 0x180   : > { %v1403_v55 = vadd.f32 %v1388_v28, %v1266_v46 }
 0x182   : > { %v3372_v41 = vpop.permute.xlu2 %813 }
 0x183   : > { %v941_v1 = vpop.permute.xlu1 %940 }
 0x184   : > { %v809_v39 = vpop.permute.xlu0 %808  ;;  %v978_v59 = vmul.f32 %v3141_v13, %v941_v1 }
 0x185   : > { %v842_v32 = vmul.f32 %v3133_v2, %v809_v39 }
 0x186   : > { %v993_v36 = vadd.f32 %v978_v59, %v856_v58 }
 0x187   : > { %v857_v21 = vadd.f32 %v842_v32, %v720_v60 }
 0x188   : > { %v1130_v50 = vadd.f32 %v1115_v23, %v993_v36 }
 0x18a   : > { %v3384_v42 = vpop.permute.xlu2 %818 }
 0x18b   : > { %v946_v33 = vpop.permute.xlu1 %945 }
 0x18c   : > { %v1479_v49 = vpop.permute.xlu0 %1478  ;;  %v979_v7 = vmul.f32 %v3141_v13, %v946_v33 }
 0x18d   : > { %v1524_v11 = vmul.f32 %v3186_v44, %v1479_v49 }
 0x18e   : > { %v994_v49 = vadd.f32 %v979_v7, %v857_v21  ;;  %v2448_v7 = vld [vmem:[%s2895_s25 + $0xe6] ss:$2 sm:$0xf] }
 0x18f   : > { %v1539_v57 = vadd.f32 %v1524_v11, %v1402_v45  ;;  %v1116_v45 = vmul.f32 %v3160_v24, %v3360_v47 }
 0x191   : > { %v1558_v17 = vadd.f32 %v3204_v48, %v1539_v57  ;;  %v1131_v46 = vadd.f32 %v1116_v45, %v994_v49  ;;  %v2478_v45 = vld [vmem:[%s2895_s25 + $0xec] ss:$2 sm:$0xf] }
 0x192   : > { %v1489_v29 = vpop.permute.xlu2 %1488 }
 0x193   : > { %v1573_v27 = vmax.f32 %v1558_v17, 0.0  ;;  %v3378_v35 = vpop.permute.xlu1 %676  ;;  %v1526_v33 = vmul.f32 %v3186_v44, %v1489_v29  ;;  %v1935_v29 = vld [vmem:[%s3807_s3 + $0x70] sm:$0xff] }
 0x194   : > { %v1484_v56 = vpop.permute.xlu0 %1483 }
 0x195   : > { %1589 = vst.msk [vmem:[#allocation2 + $0x38] sm:$0xff] %vm1581_vm0, %v1573_v27  ;;  %v1525_v38 = vmul.f32 %v3186_v44, %v1484_v56 }
 0x197   : > { %v1540_v19 = vadd.f32 %v1525_v38, %v1403_v55 }
 0x199   : > { %v1559_v16 = vadd.f32 %v3204_v48, %v1540_v19 }
 0x19a   : > { %v1494_v17 = vpop.permute.xlu2 %1493 }
 0x19b   : > { %v1574_v5 = vmax.f32 %v1559_v16, 0.0  ;;  %v3390_v30 = vpop.permute.xlu1 %681  ;;  %v1527_v63 = vmul.f32 %v3186_v44, %v1494_v17 }
 0x19c   : > { %v1215_v37 = vpop.permute.xlu0 %1214  ;;  %v1650_v52 = vld [vmem:[#allocation2 + $0x2c] ss:$2 sm:$0xff] }
 0x19d   : > { %1590 = vst.msk [vmem:[#allocation2 + $0x40] sm:$0xff] %vm1581_vm0, %v1574_v5  ;;  %v1252_v6 = vmul.f32 %v3168_v51, %v1215_v37  ;;  %v1662_v5 = vld [vmem:[#allocation2 + $0x2f] ss:$2 sm:$0xff] }
 0x19f   : > { %v1267_v31 = vadd.f32 %v1252_v6, %v1130_v50  ;;  %v1936_v6 = vld [vmem:[%s3807_s3 + $0x78] sm:$0xff]  ;;  %v1934_v50 = vld [vmem:[%s3807_s3 + $0x68] sm:$0xff] }
 0x1a0   : > { %1961 = vmatpush.msra.mxu0 %v1936_v6 }
 0x1a2   : > { %v3417_v58 = vpop.permute.xlu2 %686  ;;  %1962 = vmatpush.msra.mxu0 %v1935_v29 }
 0x1a3   : > { %v1352_v1 = vpop.permute.xlu1 %1351 }
 0x1a4   : > { %v1389_v54 = vmul.f32 %v3181_v8, %v1352_v1  ;;  %v1220_v12 = vpop.permute.xlu0 %1219  ;;  %v1698_v3 = vld [vmem:[#allocation2 + $0x38] ss:$2 sm:$0xff]  ;;  %v1640_v43 = vld [vmem:[#allocation2 + $0x39] ss:$2 sm:$0xff]  ;;  %v706_v1 = vmul.f32 %v3048_v4, %v3378_v35  ;;  %1963 = vmatpush.msra.mxu0 %v1934_v50 }
 0x1a5   : > { %v1628_v53 = vld [vmem:[#allocation2 + $0x36] ss:$2 sm:$0xff]  ;;  %2541 = vmatmul.msk.f32.gmra.mxu1 %vm1581_vm0, %v1698_v3  ;;  %v2646_v39 = vpack.i.bf16 %v1640_v43, %v1638_v18  ;;  %v1616_v0 = vld [vmem:[#allocation2 + $0x33] ss:$2 sm:$0xff]  ;;  %v1253_v20 = vmul.f32 %v3168_v51, %v1220_v12 }
 0x1a6   : > { %v2641_v15 = vpack.i.bf16 %v1628_v53, %v1626_v62  ;;  %v1404_v40 = vadd.f32 %v1389_v54, %v1267_v31  ;;  %v2636_v61 = vpack.i.bf16 %v1616_v0, %v1614_v10  ;;  %v1686_v62 = vld [vmem:[#allocation2 + $0x35] ss:$2 sm:$0xff]  ;;  %v1674_v21 = vld [vmem:[#allocation2 + $0x32] ss:$2 sm:$0xff]  ;;  %v721_v35 = vadd.f32 %v706_v1, %v3001_v25  ;;  %v1930_v25 = vld [vmem:[%s3807_s3 + $0x48] sm:$0xff] }
 0x1a7   : > { %2647 = vrot.lane.b32.xlu2 %v2646_v39, %s3816_s29  ;;  %v1268_v56 = vadd.f32 %v1253_v20, %v1131_v46  ;;  %v1933_v53 = vld [vmem:[%s3807_s3 + $0x60] sm:$0xff]  ;;  %v1932_v4 = vld [vmem:[%s3807_s3 + $0x58] sm:$0xff]  ;;  %v843_v10 = vmul.f32 %v3133_v2, %v3372_v41  ;;  %v2493_v20 = vld [vmem:[%s2895_s25 + $0xef] ss:$2 sm:$0xf] }
 0x1a8   : > { %2642 = vrot.lane.b32.xlu1 %v2641_v15, %s3814_s14  ;;  %v1541_v11 = vadd.f32 %v1526_v33, %v1404_v40  ;;  %2637 = vrot.lane.b32.xlu0 %v2636_v61, %s3817_s28  ;;  %v1931_v15 = vld [vmem:[%s3807_s3 + $0x50] sm:$0xff] }
 0x1a9   : > { %1964 = vmatpush.msra.mxu0 %v1933_v53  ;;  %v858_v33 = vadd.f32 %v843_v10, %v721_v35  ;;  %v1923_v1 = vld [vmem:[%s3807_s3 + $0x10] sm:$0xff] }
 0x1aa   : > { %v1560_v57 = vadd.f32 %v3204_v48, %v1541_v11  ;;  %v824_v39 = vpop.permute.xlu2 %823  ;;  %v3458_v11 = vld [vmem:[%s3805_s1 + $0x2] ss:$0 sm:$0xff] }
 0x1ab   : > { %v1357_v28 = vpop.permute.xlu1 %1356  ;;  %1965 = vmatpush.msra.mxu0 %v1932_v4  ;;  %v707_v41 = vmul.f32 %v3458_v11, %v3390_v30  ;;  %v1927_v30 = vld [vmem:[%s3807_s3 + $0x30] sm:$0xff]  ;;  %v708_v29 = vmul.f32 %v3458_v11, %v3417_v58 }
 0x1ac   : > { %v1575_v27 = vmax.f32 %v1560_v57, 0.0  ;;  %v1390_v55 = vmul.f32 %v3181_v8, %v1357_v28  ;;  %v951_v38 = vpop.permute.xlu0 %950  ;;  %v1929_v57 = vld [vmem:[%s3807_s3 + $0x40] sm:$0xff]  ;;  %v2463_v28 = vld [vmem:[%s2895_s25 + $0xe9] ss:$2 sm:$0xf] }
 0x1ad   : > { %v980_v0 = vmul.f32 %v3141_v13, %v951_v38  ;;  %1966 = vmatpush.msra.mxu0 %v1931_v15  ;;  %v722_v38 = vadd.f32 %v707_v41, %v3064_v26 }
 0x1ae   : > { %1591 = vst.msk [vmem:[#allocation2 + $0x48] sm:$0xff] %vm1581_vm0, %v1575_v27  ;;  %v1405_v47 = vadd.f32 %v1390_v55, %v1268_v56  ;;  %v1928_v27 = vld [vmem:[%s3807_s3 + $0x38] sm:$0xff] }
 0x1af   : > { %1967 = vmatpush.msra.mxu0 %v1930_v25  ;;  %v995_v46 = vadd.f32 %v980_v0, %v858_v33 }
 0x1b0   : > { %v1542_v19 = vadd.f32 %v1527_v63, %v1405_v47 }
 0x1b1   : > { %1968 = vmatpush.msra.mxu0 %v1929_v57 }
 0x1b2   : > { %v1561_v14 = vadd.f32 %v3204_v48, %v1542_v19  ;;  %v961_v63 = vpop.permute.xlu2 %960  ;;  %v1926_v19 = vld [vmem:[%s3807_s3 + $0x28] sm:$0xff] }
 0x1b3   : > { %v1088_v16 = vpop.permute.xlu1 %1087  ;;  %1969 = vmatpush.msra.mxu0 %v1928_v27 }
 0x1b4   : > { %v1576_v9 = vmax.f32 %v1561_v14, 0.0  ;;  %v3415_v59 = vpop.permute.xlu0 %955  ;;  %v1117_v40 = vmul.f32 %v3160_v24, %v1088_v16  ;;  %v844_v14 = vmul.f32 %v3133_v2, %v3384_v42  ;;  %v2508_v42 = vld [vmem:[%s2895_s25 + $0xf2] ss:$2 sm:$0xf] }
 0x1b5   : > { %v1664_v37 = vld [vmem:[#allocation2 + $0x3f] ss:$2 sm:$0xff]  ;;  %v1652_v36 = vld [vmem:[#allocation2 + $0x3c] ss:$2 sm:$0xff]  ;;  %v981_v16 = vmul.f32 %v3141_v13, %v3415_v59  ;;  %1970 = vmatpush.msra.mxu0 %v1927_v30 }
 0x1b6   : > { %1592 = vst.msk [vmem:[#allocation2 + $0x50] sm:$0xff] %vm1581_vm0, %v1576_v9  ;;  %v2656_v23 = vpack.i.bf16 %v1664_v37, %v1662_v5  ;;  %v2651_v32 = vpack.i.bf16 %v1652_v36, %v1650_v52  ;;  %v1132_v56 = vadd.f32 %v1117_v40, %v995_v46  ;;  %v859_v52 = vadd.f32 %v844_v14, %v722_v38  ;;  %v1924_v59 = vld [vmem:[%s3807_s3 + $0x18] sm:$0xff] }
 0x1b7   : > { %1971 = vmatpush.msra.mxu0 %v1926_v19 }
 0x1b8   : > { %2657 = vrot.lane.b32.xlu1 %v2656_v23, %s2789_s17  ;;  %2652 = vrot.lane.b32.xlu0 %v2651_v32, %s2788_s16  ;;  %v2523_v23 = vld [vmem:[%s2895_s25 + $0xf5] ss:$2 sm:$0xf]  ;;  %v1925_v32 = vld [vmem:[%s3807_s3 + $0x20] sm:$0xff] }
 0x1b9   : > { %1972 = vmatpush.msra.mxu0 %v1925_v32 }
 0x1bb   : > { %v1225_v60 = vpop.permute.xlu1 %1224  ;;  %1973 = vmatpush.msra.mxu0 %v1924_v59 }
 0x1bc   : > { %v1093_v18 = vpop.permute.xlu0 %1092  ;;  %v1254_v17 = vmul.f32 %v3168_v51, %v1225_v60  ;;  %v996_v60 = vadd.f32 %v981_v16, %v859_v52  ;;  %v1598_v52 = vld [vmem:[#allocation2] ss:$2 sm:$0xff] }
 0x1bd   : > { %v1700_v31 = vld [vmem:[#allocation2 + $0x48] ss:$2 sm:$0xff]  ;;  %v1688_v54 = vld [vmem:[#allocation2 + $0x45] ss:$2 sm:$0xff]  ;;  %v1118_v36 = vmul.f32 %v3160_v24, %v1093_v18  ;;  %v845_v18 = vmul.f32 %v3133_v2, %v824_v39  ;;  %1974 = vmatpush.msra.mxu0 %v1923_v1 }
 0x1be   : > { %v1676_v12 = vld [vmem:[#allocation2 + $0x42] ss:$2 sm:$0xff]  ;;  %2542 = vmatmul.msk.f32.gmra.mxu1 %vm1581_vm0, %v1700_v31  ;;  %v2666_v3 = vpack.i.bf16 %v1688_v54, %v1686_v62  ;;  %v1269_v47 = vadd.f32 %v1254_v17, %v1132_v56  ;;  %v723_v54 = vadd.f32 %v708_v29, %v3060_v22  ;;  %v2538_v22 = vld [vmem:[%s2895_s25 + $0xf8] ss:$2 sm:$0xf]  ;;  %s3822_s25 = smov 48  }
 0x1bf   : > { %v2661_v43 = vpack.i.bf16 %v1676_v12, %v1674_v21  ;;  %v1133_v62 = vadd.f32 %v1118_v36, %v996_v60  ;;  %v1922_v31 = vld [vmem:[%s3807_s3 + $0x8] sm:$0xff]  ;;  %v982_v12 = vmul.f32 %v3141_v13, %v961_v63  ;;  %v1921_v39 = vld [vmem:[%s3807_s3] sm:$0xff]  ;;  %v1600_v29 = vld [vmem:[#allocation2 + $0x10] ss:$2 sm:$0xff] }
 0x1c0   : > { %691 = vperm.xlu0 %2598, %v2448_v7   ;;  %2667 = vrot.lane.b32.xlu1 %v2666_v3, %s2790_s21  ;;  %v1235_v3 = vpop.permute.xlu2 %1234  ;;  %v860_v4 = vadd.f32 %v845_v18, %v723_v54  ;;  %v1642_v30 = vld [vmem:[#allocation2 + $0x49] ss:$2 sm:$0xff]  ;;  %v1630_v16 = vld [vmem:[#allocation2 + $0x46] ss:$2 sm:$0xff] }
 0x1c1   : > { %2662 = vrot.lane.b32.xlu2 %v2661_v43, %s3818_s22  ;;  %1975 = vmatpush.msra.mxu0 %v1922_v31  ;;  %v1256_v33 = vmul.f32 %v3168_v51, %v1235_v3 }
 0x1c2   : > { %v997_v13 = vadd.f32 %v982_v12, %v860_v4 }
 0x1c3   : > { %v1362_v49 = vpop.permute.xlu1 %1361  ;;  %1976 = vmatpush.msra.mxu0 %v1921_v39 }
 0x1c4   : > { %v1230_v61 = vpop.permute.xlu0 %1229  ;;  %v1391_v55 = vmul.f32 %v3181_v8, %v1362_v49 }
 0x1c5   : > { %v1255_v7 = vmul.f32 %v3168_v51, %v1230_v61  ;;  %v1618_v61 = vld [vmem:[#allocation2 + $0x43] ss:$2 sm:$0xff] }
 0x1c6   : > { %v1406_v5 = vadd.f32 %v1391_v55, %v1269_v47 }
 0x1c7   : > { %v1270_v43 = vadd.f32 %v1255_v7, %v1133_v62 }
 0x1c8   : > { %965 = vperm.xlu0 %2598, %v2478_v45   ;;  %1102 = vperm.xlu1 %2599, %v2493_v20  }
 0x1c9   : > { %828 = vperm.xlu2 %2600, %v2463_v28  }
 0x1cb   : > { %v1499_v9 = vpop.permute.xlu1 %1498 }
 0x1cc   : > { %v1528_v26 = vmul.f32 %v3186_v44, %v1499_v9  ;;  %v1367_v37 = vpop.permute.xlu0 %1366 }
 0x1cd   : > { %v1392_v21 = vmul.f32 %v3181_v8, %v1367_v37 }
 0x1ce   : > { %v1543_v6 = vadd.f32 %v1528_v26, %v1406_v5 }
 0x1cf   : > { %v1407_v35 = vadd.f32 %v1392_v21, %v1270_v43 }
 0x1d0   : > { %v1562_v50 = vadd.f32 %v3204_v48, %v1543_v6  ;;  %1376 = vperm.xlu0 %2598, %v2523_v23  }
 0x1d1   : > { %1239 = vperm.xlu2 %2600, %v2508_v42  }
 0x1d2   : > { %v1577_v58 = vmax.f32 %v1562_v50, 0.0 }
 0x1d3   : > { %v1098_v53 = vpop.permute.xlu1 %1097 }
 0x1d4   : > { %1593 = vst.msk [vmem:[#allocation2 + $0x58] sm:$0xff] %vm1581_vm0, %v1577_v58  ;;  %v1504_v2 = vpop.permute.xlu0 %1503  ;;  %v1119_v15 = vmul.f32 %v3160_v24, %v1098_v53  ;;  %v2603_v24 = vpop.permute.xlu2 %2602 }
 0x1d5   : > { %v1529_v10 = vmul.f32 %v3186_v44, %v1504_v2  ;;  %v2604_v5 = vunpack.i.l.bf16 %v2603_v24  ;;  %v2605_v6 = vunpack.i.h.bf16 %v2603_v24 }
 0x1d6   : > { %v1134_v49 = vadd.f32 %v1119_v15, %v997_v13 }
 0x1d7   : > { %v1544_v0 = vadd.f32 %v1529_v10, %v1407_v35  ;;  %v1873_v36 = vsel %vm1581_vm0, %v1598_v52, %v2604_v5  ;;  %v1874_v58 = vsel %vm1581_vm0, %v1600_v29, %v2605_v6 }
 0x1d8   : > { %1513 = vperm.xlu0 %2598, %v2538_v22   ;;  %v1271_v46 = vadd.f32 %v1256_v33, %v1134_v49 }
 0x1d9   : > { %v1563_v25 = vadd.f32 %v3204_v48, %v1544_v0 }
 0x1db   : > { %v1578_v40 = vmax.f32 %v1563_v25, 0.0  ;;  %v1620_v45 = vld [vmem:[#allocation2 + $0x53] ss:$2 sm:$0x3f]  ;;  %v1509_v41 = vpop.permute.xlu1 %1508  ;;  %v1654_v62 = vld [vmem:[#allocation2 + $0x4c] ss:$2 sm:$0xff] }
 0x1dc   : > { %v1372_v20 = vpop.permute.xlu0 %1371  ;;  %v2671_v57 = vpack.i.bf16 %v1620_v45, %v1618_v61  ;;  %v1530_v28 = vmul.f32 %v3186_v44, %v1509_v41  ;;  %v1666_v56 = vld [vmem:[#allocation2 + $0x4f] ss:$2 sm:$0xff]  ;;  %v2618_v19 = vpop.permute.xlu2 %2617 }
 0x1dd   : > { %1594 = vst.msk [vmem:[#allocation2 + $0x60] sm:$0xff] %vm1581_vm0, %v1578_v40  ;;  %v1393_v17 = vmul.f32 %v3181_v8, %v1372_v20  ;;  %v2619_v1 = vunpack.i.l.bf16 %v2618_v19  ;;  %v2620_v10 = vunpack.i.h.bf16 %v2618_v19 }
 0x1de   : > { %2672 = vrot.lane.b32.xlu1 %v2671_v57, %s3817_s28  ;;  %s3824_s28 = smov 96  }
 0x1df   : > { %v1408_v27 = vadd.f32 %v1393_v17, %v1271_v46  ;;  %v1602_v46 = vld [vmem:[#allocation2 + $0x20] ss:$2 sm:$0xff] }
 0x1e0   : > { %1815 = vrot.lane.b32.xlu0 %v1666_v56, %s2789_s17 }
 0x1e1   : > { %v1545_v51 = vadd.f32 %v1530_v28, %v1408_v27 }
 0x1e3   : > { %v1564_v55 = vadd.f32 %v3204_v48, %v1545_v51  ;;  %v2613_v26 = vpop.permute.xlu1 %2612 }
 0x1e4   : > { %v2608_v38 = vpop.permute.xlu0 %2607  ;;  %v1702_v63 = vld [vmem:[#allocation2 + $0x58] ss:$2 sm:$0xff]  ;;  %v1644_v47 = vld [vmem:[#allocation2 + $0x59] ss:$2 sm:$0x3f]  ;;  %v2614_v23 = vunpack.i.l.bf16 %v2613_v26  ;;  %v2633_v18 = vpop.permute.xlu2 %2632  ;;  %v2615_v31 = vunpack.i.h.bf16 %v2613_v26 }
 0x1e5   : > { %v1579_v14 = vmax.f32 %v1564_v55, 0.0  ;;  %2543 = vmatmul.msk.f32.gmra.mxu1 %vm1581_vm0, %v1702_v63  ;;  %v2681_v8 = vpack.i.bf16 %v1644_v47, %v1642_v30  ;;  %v1632_v9 = vld [vmem:[#allocation2 + $0x56] ss:$2 sm:$0x3f]  ;;  %v2609_v37 = vunpack.i.l.bf16 %v2608_v38  ;;  %v2610_v59 = vunpack.i.h.bf16 %v2608_v38  ;;  %v1690_v0 = vld [vmem:[#allocation2 + $0x55] ss:$2 sm:$0xff] }
 0x1e6   : > { %v2676_v44 = vpack.i.bf16 %v1632_v9, %v1630_v16  ;;  %v1656_v48 = vld [vmem:[#allocation2 + $0x5c] ss:$2 sm:$0x3f]  ;;  %v2634_v53 = vunpack.i.l.bf16 %v2633_v18  ;;  %v2635_v40 = vunpack.i.h.bf16 %v2633_v18 }
 0x1e7   : > { %1595 = vst.msk [vmem:[#allocation2 + $0x68] sm:$0xff] %vm1581_vm0, %v1579_v14  ;;  %2682 = vrot.lane.b32.xlu1 %v2681_v8, %s3822_s25  ;;  %v1880_v32 = vsel %vm1879_vm1, %v1873_v36, %v2609_v37  ;;  %v1678_v50 = vld [vmem:[#allocation2 + $0x52] ss:$2 sm:$0xff]  ;;  %v1881_v12 = vsel %vm1879_vm1, %v1874_v58, %v2610_v59  ;;  %s3825_s25 = smov 16  }
 0x1e8   : > { %2677 = vrot.lane.b32.xlu2 %v2676_v44, %s3823_s26  ;;  %1793 = vrot.lane.b32.xlu0 %v1656_v48, %s2788_s16  ;;  %v1887_v60 = vsel %vm1886_vm2, %v1880_v32, %v2614_v23  ;;  %v1888_v4 = vsel %vm1886_vm2, %v1881_v12, %v2615_v31  ;;  %v1604_v14 = vld [vmem:[#allocation2 + $0x30] ss:$2 sm:$0xff]  ;;  %v2713_v31 = vld [vmem:[%s3805_s1 + $0x3] ss:$0 sm:$0xff]  ;;  %v2714_v12 = vld [vmem:[%s3805_s1 + $0x4] ss:$0 sm:$0xff] }
 0x1e9   : > { %v1894_v43 = vsel %vm1893_vm3, %v1887_v60, %v2619_v1  ;;  %v1895_v49 = vsel %vm1893_vm3, %v1888_v4, %v2620_v10  ;;  %v2716_v10 = vld [vmem:[%s3805_s1 + $0x6] ss:$0 sm:$0xff] }
 0x1ec   : > { %v2623_v42 = vpop.permute.xlu0 %2622 }
 0x1ed   : > { %v2624_v7 = vunpack.i.l.bf16 %v2623_v42  ;;  %v2625_v35 = vunpack.i.h.bf16 %v2623_v42 }
 0x1ee   : > { %v1692_v21 = vld [vmem:[#allocation2 + $0x65] ss:$2 sm:$0x3f]  ;;  %v1680_v45 = vld [vmem:[#allocation2 + $0x62] ss:$2 sm:$0x3f] }
 0x1ef   : > { %1839 = vrot.lane.b32.xlu1 %v1678_v50, %s3818_s22  ;;  %v1901_v2 = vsel %vm1900_vm4, %v1894_v43, %v2624_v7  ;;  %v1668_v13 = vld [vmem:[#allocation2 + $0x5f] ss:$2 sm:$0x3f]  ;;  %v1902_v25 = vsel %vm1900_vm4, %v1895_v49, %v2625_v35 }
 0x1f0   : > { %1791 = vrot.lane.b32.xlu2 %v1654_v62, %s2788_s16  ;;  %1865 = vrot.lane.b32.xlu0 %v1692_v21, %s2790_s21 }
 0x1f1   : > { %v2628_v54 = vpop.permute.xlu1 %2627 }
 0x1f2   : > { %v2629_v3 = vunpack.i.l.bf16 %v2628_v54  ;;  %v2630_v22 = vunpack.i.h.bf16 %v2628_v54 }
 0x1f4   : > { %v1908_v39 = vsel %vm1907_vm5, %v1901_v2, %v2629_v3  ;;  %v1909_v33 = vsel %vm1907_vm5, %v1902_v25, %v2630_v22 }
 0x1f5   : > { %v1915_v15 = vsel %vm1914_vm6, %v1908_v39, %v2634_v53  ;;  %v1916_v61 = vsel %vm1914_vm6, %v1909_v33, %v2635_v40  ;;  %v2718_v40 = vld [vmem:[%s3805_s1 + $0x8] ss:$0 sm:$0xff] }
 0x1f6   : > { %1977 = vmatmul.f32.vlgmr.msra.gmra.mxu0 %v1915_v15 }
 0x1f7   : > { %1817 = vrot.lane.b32.xlu1 %v1668_v13, %s2789_s17  ;;  %v2717_v13 = vld [vmem:[%s3805_s1 + $0x7] ss:$0 sm:$0xff]  ;;  %s323_s17 = sand.u32 1, %s2774_s10  }
 0x1f8   : > { %1863 = vrot.lane.b32.xlu2 %v1690_v0, %s2790_s21  ;;  %s324_s24 = scalar_lea.vmem [#allocation5], %s323_s17  ;;  %s2332_s14 = scalar_lea.sflag [#allocation6], %s323_s17 }
 0x1f9   : > { %s2342_s29 = sshll.u32 %s324_s24, 4  ;;  %s2343_s29 = int_to_ptr.vmem [resolvable:$true] %s2342_s29 }
 0x1fe   : > { %1980 = vmatmul.f32.gmra.mxu0 %v1916_v61 }
 0x200   : > { %1841 = vrot.lane.b32.xlu2 %v1680_v45, %s3818_s22 }
 0x201   : > { %v2648_v17 = vpop.permute.xlu2 %2647 }
 0x202   : > { %v2649_v55 = vunpack.i.l.bf16 %v2648_v17  ;;  %v2650_v36 = vunpack.i.h.bf16 %v2648_v17 }
 0x21a   : > { %v2638_v41 = vpop.permute.xlu0 %2637  ;;  %v2643_v20 = vpop.permute.xlu1 %2642 }
 0x21b   : > { %v2639_v57 = vunpack.i.l.bf16 %v2638_v41  ;;  %v2644_v24 = vunpack.i.l.bf16 %v2643_v20  ;;  %v2640_v30 = vunpack.i.h.bf16 %v2638_v41  ;;  %v2645_v19 = vunpack.i.h.bf16 %v2643_v20  ;;  %v2663_v9 = vpop.permute.xlu2 %2662  ;;  %v2719_v20 = vld [vmem:[%s3806_s2] ss:$0 sm:$0xff] }
 0x21c   : > { %v2664_v26 = vunpack.i.l.bf16 %v2663_v9  ;;  %v2665_v1 = vunpack.i.h.bf16 %v2663_v9  ;;  %v1608_v9 = vld [vmem:[#allocation2 + $0x50] ss:$2 sm:$0x3f] }
 0x21d   : > { %v1875_v28 = vsel %vm1581_vm0, %v1602_v46, %v2639_v57  ;;  %v1876_v16 = vsel %vm1581_vm0, %v1604_v14, %v2640_v30 }
 0x21e   : > { %v1882_v27 = vsel %vm1879_vm1, %v1875_v28, %v2644_v24  ;;  %v1883_v44 = vsel %vm1879_vm1, %v1876_v16, %v2645_v19 }
 0x21f   : > { %v1889_v47 = vsel %vm1886_vm2, %v1882_v27, %v2649_v55  ;;  %v1890_v42 = vsel %vm1886_vm2, %v1883_v44, %v2650_v36  ;;  %v1606_v27 = vld [vmem:[#allocation2 + $0x40] ss:$2 sm:$0xff] }
 0x223   : > { %v829_v18 = vpop.permute.xlu2 %828 }
 0x224   : > { %v846_v54 = vmul.f32 %v2713_v31, %v829_v18  ;;  %v2706_v18 = vld [vmem:[%s3808_s4] ss:$0 sm:$0xff] }
 0x22a   : > { %v2658_v56 = vpop.permute.xlu1 %2657  ;;  %v2653_v51 = vpop.permute.xlu0 %2652 }
 0x22b   : > { %v2654_v38 = vunpack.i.l.bf16 %v2653_v51  ;;  %v2659_v63 = vunpack.i.l.bf16 %v2658_v56  ;;  %v2655_v37 = vunpack.i.h.bf16 %v2653_v51  ;;  %v2660_v6 = vunpack.i.h.bf16 %v2658_v56  ;;  %v1240_v35 = vpop.permute.xlu2 %1239 }
 0x22c   : > { %v1257_v22 = vmul.f32 %v2716_v10, %v1240_v35 }
 0x22d   : > { %v1896_v8 = vsel %vm1893_vm3, %v1889_v47, %v2654_v38  ;;  %v1897_v29 = vsel %vm1893_vm3, %v1890_v42, %v2655_v37 }
 0x22e   : > { %v1903_v5 = vsel %vm1900_vm4, %v1896_v8, %v2659_v63  ;;  %v1904_v50 = vsel %vm1900_vm4, %v1897_v29, %v2660_v6 }
 0x22f   : > { %v1910_v32 = vsel %vm1907_vm5, %v1903_v5, %v2664_v26  ;;  %v1911_v58 = vsel %vm1907_vm5, %v1904_v50, %v2665_v1 }
 0x232   : > { %v2668_v48 = vpop.permute.xlu1 %2667  ;;  %v692_v52 = vpop.permute.xlu0 %691 }
 0x233   : > { %v2669_v23 = vunpack.i.l.bf16 %v2668_v48  ;;  %v709_v60 = vmul.f32 %v3458_v11, %v692_v52  ;;  %v2670_v7 = vunpack.i.h.bf16 %v2668_v48 }
 0x235   : > { %v1917_v59 = vsel %vm1914_vm6, %v1910_v32, %v2669_v23  ;;  %v724_v21 = vadd.f32 %v709_v60, %v3012_v34  ;;  %v1918_v3 = vsel %vm1914_vm6, %v1911_v58, %v2670_v7  ;;  %v2715_v34 = vld [vmem:[%s3805_s1 + $0x5] ss:$0 sm:$0xff]  ;;  %v2013_v58 = vpop.f32.mrf.mxu1 }
 0x236   : > { %1983 = vmatmul.f32.gmra.mxu0 %v1917_v59 }
 0x237   : > { %v861_v43 = vadd.f32 %v846_v54, %v724_v21 }
 0x23a   : > { %v966_v62 = vpop.permute.xlu0 %965  ;;  %v1103_v53 = vpop.permute.xlu1 %1102 }
 0x23b   : > { %v983_v11 = vmul.f32 %v2714_v12, %v966_v62  ;;  %v1120_v4 = vmul.f32 %v2715_v34, %v1103_v53 }
 0x23d   : > { %v998_v2 = vadd.f32 %v983_v11, %v861_v43 }
 0x23e   : > { %1986 = vmatmul.f32.gmra.mxu0 %v1918_v3  ;;  %v2016_v3 = vpop.f32.mrf.mxu1 }
 0x23f   : > { %v1135_v15 = vadd.f32 %v1120_v4, %v998_v2 }
 0x241   : > { %v1272_v49 = vadd.f32 %v1257_v22, %v1135_v15 }
 0x242   : > { %v1377_v39 = vpop.permute.xlu0 %1376  ;;  %v2678_v45 = vpop.permute.xlu2 %2677 }
 0x243   : > { %v1394_v0 = vmul.f32 %v2717_v13, %v1377_v39  ;;  %v2679_v55 = vunpack.i.l.bf16 %v2678_v45  ;;  %v2680_v36 = vunpack.i.h.bf16 %v2678_v45 }
 0x245   : > { %v1409_v33 = vadd.f32 %v1394_v0, %v1272_v49 }
 0x246   : > { %v2019_v34 = vpop.f32.mrf.mxu1 }
 0x24a   : > { %v1514_v25 = vpop.permute.xlu0 %1513  ;;  %v1792_v28 = vpop.permute.xlu2 %1791 }
 0x24b   : > { %v1531_v61 = vmul.f32 %v2718_v40, %v1514_v25 }
 0x24d   : > { %v1546_v41 = vadd.f32 %v1531_v61, %v1409_v33 }
 0x24e   : > { %v2022_v22 = vpop.f32.mrf.mxu1 }
 0x24f   : > { %v1565_v57 = vadd.f32 %v2719_v20, %v1546_v41 }
 0x250   : > { %v2673_v24 = vpop.permute.xlu1 %2672 }
 0x251   : > { %v1580_v46 = vmax.f32 %v1565_v57, 0.0  ;;  %v2674_v17 = vunpack.i.l.bf16 %v2673_v24  ;;  %v2675_v14 = vunpack.i.h.bf16 %v2673_v24  ;;  %v2154_v24 = vld [vmem:[%s3809_s5 + $0x78] sm:$0xff] }
 0x252   : > { %v1816_v56 = vpop.permute.xlu0 %1815  ;;  %v1864_v16 = vpop.permute.xlu2 %1863  ;;  %2185 = vmatpush.msra.mxu2 %v2154_v24 }
 0x253   : > { %1597 = vst.msk [vmem:[#allocation2 + $0x70] sm:$0xf] %vm1596_vm7, %v1580_v46  ;;  %v1877_v51 = vsel %vm1581_vm0, %v1606_v27, %v2674_v17  ;;  %v1878_v37 = vsel %vm1581_vm0, %v1608_v9, %v2675_v14  ;;  %v2153_v46 = vld [vmem:[%s3809_s5 + $0x70] sm:$0xff]  ;;  %v2152_v17 = vld [vmem:[%s3809_s5 + $0x68] sm:$0xff]  ;;  %v2150_v27 = vld [vmem:[%s3809_s5 + $0x58] sm:$0xff] }
 0x254   : > { %v1884_v47 = vsel %vm1879_vm1, %v1877_v51, %v2679_v55  ;;  %v1885_v32 = vsel %vm1879_vm1, %v1878_v37, %v2680_v36  ;;  %2186 = vmatpush.msra.mxu2 %v2153_v46  ;;  %v2149_v37 = vld [vmem:[%s3809_s5 + $0x50] sm:$0xff]  ;;  %v2146_v36 = vld [vmem:[%s3809_s5 + $0x38] sm:$0xff]  ;;  %v2155_v46 = vld [vmem:[%s3809_s5 + $0x80] sm:$0xff] }
 0x256   : > { %2187 = vmatpush.msra.mxu2 %v2152_v17 }
 0x259   : > { %v2683_v30 = vpop.permute.xlu1 %2682 }
 0x25a   : > { %v2684_v38 = vunpack.i.l.bf16 %v2683_v30  ;;  %v1704_v63 = vld [vmem:[#allocation2 + $0x68] ss:$2 sm:$0x3f]  ;;  %v1794_v5 = vpop.permute.xlu0 %1793  ;;  %v2685_v48 = vunpack.i.h.bf16 %v2683_v30  ;;  %v1842_v29 = vpop.permute.xlu2 %1841 }
 0x25b   : > { %2544 = vmatmul.msk.f32.gmra.mxu1 %vm1581_vm0, %v1704_v63 }
 0x25c   : > { %v1891_v19 = vsel %vm1886_vm2, %v1884_v47, %v2684_v38  ;;  %v1892_v6 = vsel %vm1886_vm2, %v1885_v32, %v2685_v48  ;;  %v2148_v48 = vld [vmem:[%s3809_s5 + $0x48] sm:$0xff] }
 0x25d   : > { %v1898_v8 = vsel %vm1893_vm3, %v1891_v19, %v1792_v28  ;;  %v1899_v42 = vsel %vm1893_vm3, %v1892_v6, %v1794_v5  ;;  %v2151_v28 = vld [vmem:[%s3809_s5 + $0x60] sm:$0xff]  ;;  %v2144_v32 = vld [vmem:[%s3809_s5 + $0x28] sm:$0xff] }
 0x25e   : > { %v1905_v26 = vsel %vm1900_vm4, %v1898_v8, %v1816_v56  ;;  %2188 = vmatpush.msra.mxu2 %v2151_v28  ;;  %v2143_v6 = vld [vmem:[%s3809_s5 + $0x20] sm:$0xff] }
 0x260   : > { %2189 = vmatpush.msra.mxu2 %v2150_v27 }
 0x261   : > { %v1840_v44 = vpop.permute.xlu1 %1839 }
 0x262   : > { %v1912_v52 = vsel %vm1907_vm5, %v1905_v26, %v1840_v44  ;;  %v1866_v7 = vpop.permute.xlu0 %1865  ;;  %v2025_v55 = vpop.f32.mrf.mxu1  ;;  %2190 = vmatpush.msra.mxu2 %v2149_v37 }
 0x263   : > { %v1919_v23 = vsel %vm1914_vm6, %v1912_v52, %v1864_v16  ;;  %v2147_v52 = vld [vmem:[%s3809_s5 + $0x40] sm:$0xff] }
 0x264   : > { %1989 = vmatmul.f32.gmra.mxu0 %v1919_v23  ;;  %2191 = vmatpush.msra.mxu2 %v2148_v48  ;;  %v2145_v23 = vld [vmem:[%s3809_s5 + $0x30] sm:$0xff]  ;;  %v2707_v48 = vld [vmem:[%s3810_s6] ss:$0 sm:$0xff] }
 0x266   : > { %2192 = vmatpush.msra.mxu2 %v2147_v52 }
 0x268   : > { %2193 = vmatpush.msra.mxu2 %v2146_v36 }
 0x269   : > { %v1818_v59 = vpop.permute.xlu1 %1817 }
 0x26a   : > { %v1906_v60 = vsel %vm1900_vm4, %v1899_v42, %v1818_v59  ;;  %2194 = vmatpush.msra.mxu2 %v2145_v23  ;;  %v2142_v42 = vld [vmem:[%s3809_s5 + $0x18] sm:$0xff]  ;;  %v2141_v59 = vld [vmem:[%s3809_s5 + $0x10] sm:$0xff] }
 0x26b   : > { %v1913_v50 = vsel %vm1907_vm5, %v1906_v60, %v1842_v29  ;;  %v2140_v29 = vld [vmem:[%s3809_s5 + $0x8] sm:$0xff]  ;;  %v2139_v60 = vld [vmem:[%s3809_s5] sm:$0xff] }
 0x26c   : > { %v1920_v1 = vsel %vm1914_vm6, %v1913_v50, %v1866_v7  ;;  %2195 = vmatpush.msra.mxu2 %v2144_v32  ;;  %v2170_v7 = vld [vmem:[%s3809_s5 + $0xf8] sm:$0xff] }
 0x26d   : > { %1992 = vmatmul.f32.gmra.mxu0 %v1920_v1  ;;  %v2174_v50 = vld [vmem:[%s3809_s5 + $0x118] sm:$0xff]  ;;  %v2169_v1 = vld [vmem:[%s3809_s5 + $0xf0] sm:$0xff]  ;;  %2208 = vmatpush.msra.mxu3 %v2170_v7 }
 0x26e   : > { %2196 = vmatpush.msra.mxu2 %v2143_v6 }
 0x26f   : > { %2209 = vmatpush.msra.mxu3 %v2169_v1 }
 0x270   : > { %2197 = vmatpush.msra.mxu2 %v2142_v42 }
 0x272   : > { %2198 = vmatpush.msra.mxu2 %v2141_v59 }
 0x273   : > { %v1978_v62 = vpop.f32.mrf.mxu0 }
 0x274   : > { %v1979_v21 = vadd.f32 %v2706_v18, %v1978_v62  ;;  %2199 = vmatpush.msra.mxu2 %v2140_v29  ;;  %v2168_v62 = vld [vmem:[%s3809_s5 + $0xe8] sm:$0xff] }
 0x275   : > { %2210 = vmatpush.msra.mxu3 %v2168_v62 }
 0x276   : > { %v2014_v31 = vadd.f32 %v2013_v58, %v1979_v21  ;;  %2200 = vmatpush.msra.mxu2 %v2139_v60  ;;  %v2172_v21 = vld [vmem:[%s3809_s5 + $0x108] sm:$0xff]  ;;  %v2167_v58 = vld [vmem:[%s3809_s5 + $0xe0] sm:$0xff] }
 0x277   : > { %2211 = vmatpush.msra.mxu3 %v2167_v58 }
 0x278   : > { %v2031_v54 = vmax.f32 %v2014_v31, 0.0  ;;  %2243 = vmatpush.msrb.mxu2 %v2174_v50  ;;  %v2171_v31 = vld [vmem:[%s3809_s5 + $0x100] sm:$0xff] }
 0x27a   : > { %2037 = vst.msk [vmem:[#allocation3] sm:$0xff] %vm1879_vm1, %v2031_v54  ;;  %v2166_v54 = vld [vmem:[%s3809_s5 + $0xd8] sm:$0xff] }
 0x27b   : > { %v1981_v12 = vpop.f32.mrf.mxu0  ;;  %2212 = vmatpush.msra.mxu3 %v2166_v54 }
 0x27c   : > { %v1982_v11 = vadd.f32 %v2706_v18, %v1981_v12  ;;  %v2165_v12 = vld [vmem:[%s3809_s5 + $0xd0] sm:$0xff] }
 0x27d   : > { %2213 = vmatpush.msra.mxu3 %v2165_v12 }
 0x27e   : > { %v2017_v43 = vadd.f32 %v2016_v3, %v1982_v11  ;;  %v2164_v11 = vld [vmem:[%s3809_s5 + $0xc8] sm:$0xff]  ;;  %v2163_v3 = vld [vmem:[%s3809_s5 + $0xc0] sm:$0xff] }
 0x27f   : > { %2214 = vmatpush.msra.mxu3 %v2164_v11 }
 0x280   : > { %v2032_v53 = vmax.f32 %v2017_v43, 0.0  ;;  %v2162_v43 = vld [vmem:[%s3809_s5 + $0xb8] sm:$0xff] }
 0x281   : > { %2215 = vmatpush.msra.mxu3 %v2163_v3 }
 0x282   : > { %2038 = vst.msk [vmem:[#allocation3 + $0x8] sm:$0xff] %vm1879_vm1, %v2032_v53  ;;  %v2161_v53 = vld [vmem:[%s3809_s5 + $0xb0] sm:$0xff] }
 0x283   : > { %2216 = vmatpush.msra.mxu3 %v2162_v43 }
 0x285   : > { %2217 = vmatpush.msra.mxu3 %v2161_v53 }
 0x2b3   : > { %v1984_v2 = vpop.f32.mrf.mxu0 }
 0x2b4   : > { %v1985_v39 = vadd.f32 %v2706_v18, %v1984_v2 }
 0x2b6   : > { %v2020_v4 = vadd.f32 %v2019_v34, %v1985_v39  ;;  %v2160_v34 = vld [vmem:[%s3809_s5 + $0xa8] sm:$0xff] }
 0x2b7   : > { %2218 = vmatpush.msra.mxu3 %v2160_v34  ;;  %v2291_v34 = vld [vmem:[%s3811_s7 + $0x20] sm:$0xff] }
 0x2b8   : > { %v2033_v35 = vmax.f32 %v2020_v4, 0.0 }
 0x2ba   : > { %2039 = vst.msk [vmem:[#allocation3 + $0x10] sm:$0xff] %vm1879_vm1, %v2033_v35 }
 0x2bb   : > { %v1987_v15 = vpop.f32.mrf.mxu0 }
 0x2bc   : > { %v1988_v10 = vadd.f32 %v2706_v18, %v1987_v15  ;;  %v2044_v15 = vld [vmem:[#allocation3] ss:$2 sm:$0xff] }
 0x2be   : > { %v2023_v13 = vadd.f32 %v2022_v22, %v1988_v10  ;;  %v2159_v10 = vld [vmem:[%s3809_s5 + $0xa0] sm:$0xff] }
 0x2bf   : > { %2219 = vmatpush.msra.mxu3 %v2159_v10  ;;  %v2287_v10 = vld [vmem:[%s3811_s7] sm:$0xff] }
 0x2c0   : > { %v2034_v0 = vmax.f32 %v2023_v13, 0.0 }
 0x2c1   : > { %v2056_v49 = vld [vmem:[#allocation3 + $0x9] ss:$2 sm:$0xff]  ;;  %v2052_v61 = vld [vmem:[#allocation3 + $0x6] ss:$2 sm:$0xff] }
 0x2c2   : > { %v2048_v25 = vld [vmem:[#allocation3 + $0x3] ss:$2 sm:$0xff]  ;;  %2040 = vst.msk [vmem:[#allocation3 + $0x18] sm:$0xff] %vm1879_vm1, %v2034_v0  ;;  %2097 = vrot.lane.b32.xlu0 %v2056_v49, %s3818_s22  ;;  %v2050_v33 = vld [vmem:[#allocation3 + $0x13] ss:$2 sm:$0x7] }
 0x2c3   : > { %v2686_v40 = vpack.i.bf16 %v2050_v33, %v2048_v25  ;;  %v2158_v49 = vld [vmem:[%s3809_s5 + $0x98] sm:$0xff] }
 0x2c4   : > { %2220 = vmatpush.msra.mxu3 %v2158_v49 }
 0x2c5   : > { %2687 = vrot.lane.b32.xlu1 %v2686_v40, %s3823_s26  ;;  %v2157_v40 = vld [vmem:[%s3809_s5 + $0x90] sm:$0xff] }
 0x2c6   : > { %2221 = vmatpush.msra.mxu3 %v2157_v40 }
 0x2c9   : > { %v2054_v45 = vld [vmem:[#allocation3 + $0x16] ss:$2 sm:$0x7]  ;;  %v2058_v20 = vld [vmem:[#allocation3 + $0x19] ss:$2 sm:$0x7] }
 0x2ca   : > { %v2691_v41 = vpack.i.bf16 %v2054_v45, %v2052_v61  ;;  %v2064_v57 = vld [vmem:[#allocation3 + $0xf] ss:$2 sm:$0xff]  ;;  %v2046_v61 = vld [vmem:[#allocation3 + $0x10] ss:$2 sm:$0x7] }
 0x2cb   : > { %v2156_v45 = vld [vmem:[%s3809_s5 + $0x88] sm:$0xff] }
 0x2cc   : > { %2692 = vrot.lane.b32.xlu2 %v2691_v41, %s2788_s16  ;;  %2222 = vmatpush.msra.mxu3 %v2156_v45 }
 0x2cd   : > { %2099 = vrot.lane.b32.xlu1 %v2058_v20, %s3818_s22  ;;  %s2740_s22 = scalar_lea.hbm %s3813_s9, 2 }
 0x2ce   : > { %2223 = vmatpush.msra.mxu3 %v2155_v46 }
 0x2d4   : > { %2105 = vrot.lane.b32.xlu2 %v2064_v57, %s3823_s26 }
 0x2d8   : > { %v2028_v19 = vpop.f32.mrf.mxu1 }
 0x2e1   : > { %v1990_v56 = vpop.f32.mrf.mxu0 }
 0x2e2   : > { %v1991_v51 = vadd.f32 %v2706_v18, %v1990_v56 }
 0x2e4   : > { %v2026_v30 = vadd.f32 %v2025_v55, %v1991_v51  ;;  %v2060_v51 = vld [vmem:[#allocation3 + $0xc] ss:$2 sm:$0xff] }
 0x2e6   : > { %v2035_v38 = vmax.f32 %v2026_v30, 0.0 }
 0x2e8   : > { %2041 = vst.msk [vmem:[#allocation3 + $0x20] sm:$0xff] %vm1879_vm1, %v2035_v38 }
 0x2ea   : > { %v1993_v63 = vpop.f32.mrf.mxu0 }
 0x2eb   : > { %v1994_v47 = vadd.f32 %v2706_v18, %v1993_v63  ;;  %v2173_v18 = vld [vmem:[%s3809_s5 + $0x110] sm:$0xff] }
 0x2ec   : > { %2244 = vmatpush.msrb.mxu2 %v2173_v18 }
 0x2ed   : > { %v2029_v14 = vadd.f32 %v2028_v19, %v1994_v47 }
 0x2ee   : > { %2245 = vmatpush.msrb.mxu2 %v2172_v21 }
 0x2ef   : > { %v2036_v8 = vmax.f32 %v2029_v14, 0.0  ;;  %v2068_v16 = vld [vmem:[#allocation3 + $0x12] ss:$2 sm:$0xff]  ;;  %v2066_v9 = vld [vmem:[#allocation3 + $0x1f] ss:$2 sm:$0x7] }
 0x2f0   : > { %2113 = vrot.lane.b32.xlu0 %v2068_v16, %s2788_s16  ;;  %2107 = vrot.lane.b32.xlu2 %v2066_v9, %s3823_s26  ;;  %v2072_v5 = vld [vmem:[#allocation3 + $0x15] ss:$2 sm:$0xff]  ;;  %v2070_v44 = vld [vmem:[#allocation3 + $0x22] ss:$2 sm:$0x7] }
 0x2f1   : > { %2043 = vst.msk [vmem:[#allocation3 + $0x28] sm:$0x3f] %vm2042_vm8, %v2036_v8  ;;  %2121 = vrot.lane.b32.xlu1 %v2072_v5, %s3824_s28  ;;  %2246 = vmatpush.msrb.mxu2 %v2171_v31  ;;  %v2076_v28 = vld [vmem:[#allocation3 + $0x18] ss:$2 sm:$0xff] }
 0x2f2   : > { %v2062_v14 = vld [vmem:[#allocation3 + $0x1c] ss:$2 sm:$0x7] }
 0x2f8   : > { %2115 = vrot.lane.b32.xlu0 %v2070_v44, %s2788_s16  ;;  %v2074_v26 = vld [vmem:[#allocation3 + $0x25] ss:$2 sm:$0x7]  ;;  %v2078_v27 = vld [vmem:[#allocation3 + $0x28] ss:$2 sm:$0x7] }
 0x2f9   : > { %2123 = vrot.lane.b32.xlu1 %v2074_v26, %s3824_s28 }
 0x326   : > { %v2693_v2 = vpop.permute.xlu2 %2692 }
 0x327   : > { %v2694_v35 = vunpack.i.l.bf16 %v2693_v2  ;;  %v2695_v20 = vunpack.i.h.bf16 %v2693_v2 }
 0x32e   : > { %v2106_v56 = vpop.permute.xlu2 %2105 }
 0x32f   : > { %v2133_v55 = vsel %vm1879_vm1, %v2060_v51, %v2106_v56 }
 0x334   : > { %v2098_v13 = vpop.permute.xlu0 %2097 }
 0x337   : > { %v2688_v39 = vpop.permute.xlu1 %2687 }
 0x338   : > { %v2689_v4 = vunpack.i.l.bf16 %v2688_v39  ;;  %v2690_v25 = vunpack.i.h.bf16 %v2688_v39  ;;  %v2292_v39 = vld [vmem:[%s3811_s7 + $0x28] sm:$0xff] }
 0x339   : > { %2307 = vmatpush.msrb.mxu3 %v2292_v39 }
 0x33a   : > { %v2127_v22 = vsel %vm1879_vm1, %v2044_v15, %v2689_v4  ;;  %v2128_v41 = vsel %vm1879_vm1, %v2046_v61, %v2690_v25  ;;  %v2290_v4 = vld [vmem:[%s3811_s7 + $0x18] sm:$0xff]  ;;  %v2288_v15 = vld [vmem:[%s3811_s7 + $0x8] sm:$0xff] }
 0x33b   : > { %v2129_v0 = vsel %vm1893_vm3, %v2127_v22, %v2694_v35  ;;  %v2130_v24 = vsel %vm1893_vm3, %v2128_v41, %v2695_v20  ;;  %2308 = vmatpush.msrb.mxu3 %v2291_v34  ;;  %v2289_v35 = vld [vmem:[%s3811_s7 + $0x10] sm:$0xff]  ;;  %v2293_v20 = vld [vmem:[%s3812_s8] sm:$0x1] }
 0x33c   : > { %v2131_v33 = vsel %vm1907_vm5, %v2129_v0, %v2098_v13 }
 0x33d   : > { %2201 = vmatmul.f32.vlgmr.msra.gmra.mxu2 %v2131_v33  ;;  %2309 = vmatpush.msrb.mxu3 %v2290_v4 }
 0x33f   : > { %v2100_v57 = vpop.permute.xlu1 %2099  ;;  %2310 = vmatpush.msrb.mxu3 %v2289_v35 }
 0x340   : > { %v2132_v17 = vsel %vm1907_vm5, %v2130_v24, %v2100_v57 }
 0x341   : > { %2311 = vmatpush.msrb.mxu3 %v2288_v15 }
 0x343   : > { %2312 = vmatpush.msrb.mxu3 %v2287_v10 }
 0x345   : > { %2204 = vmatmul.f32.gmra.mxu2 %v2132_v17 }
 0x34a   : > { %v2108_v19 = vpop.permute.xlu2 %2107 }
 0x34b   : > { %v2134_v8 = vsel %vm1879_vm1, %v2062_v14, %v2108_v19 }
 0x34d   : > { %2545 = vmatmul.msk.f32.vlgmr.msrb.gmra.mxu2 %vm1879_vm1, %v2076_v28 }
 0x355   : > { %2546 = vmatmul.msk.f32.gmra.mxu2 %vm1879_vm1, %v2078_v27 }
 0x362   : > { %v2114_v30 = vpop.permute.xlu0 %2113 }
 0x363   : > { %v2135_v38 = vsel %vm1893_vm3, %v2133_v55, %v2114_v30  ;;  %v2122_v63 = vpop.permute.xlu1 %2121 }
 0x364   : > { %v2137_v47 = vsel %vm1907_vm5, %v2135_v38, %v2122_v63 }
 0x365   : > { %2224 = vmatmul.f32.vlgmr.msra.gmra.mxu3 %v2137_v47 }
 0x36a   : > { %v2116_v16 = vpop.permute.xlu0 %2115 }
 0x36b   : > { %v2136_v9 = vsel %vm1893_vm3, %v2134_v8, %v2116_v16  ;;  %v2124_v5 = vpop.permute.xlu1 %2123 }
 0x36c   : > { %v2138_v44 = vsel %vm1907_vm5, %v2136_v9, %v2124_v5 }
 0x36d   : > { %2227 = vmatmul.f32.gmra.mxu3 %v2138_v44 }
 0x3c0   : > { %v2202_v26 = vpop.f32.mrf.mxu2 }
 0x3c1   : > { %v2203_v52 = vadd.f32 %v2707_v48, %v2202_v26 }
 0x3c8   : > { %v2205_v37 = vpop.f32.mrf.mxu2 }
 0x3c9   : > { %v2206_v59 = vadd.f32 %v2707_v48, %v2205_v37 }
 0x3d0   : > { %v2248_v36 = vpop.f32.mrf.mxu2 }
 0x3d8   : > { %v2251_v7 = vpop.f32.mrf.mxu2 }
 0x3e8   : > { %v2225_v23 = vpop.f32.mrf.mxu3 }
 0x3e9   : > { %v2226_v32 = vadd.f32 %v2225_v23, %v2203_v52 }
 0x3eb   : > { %v2249_v6 = vadd.f32 %v2248_v36, %v2226_v32 }
 0x3ed   : > { %v2254_v42 = vmax.f32 %v2249_v6, 0.0 }
 0x3ef   : > { %2256 = vst.msk [vmem:[#allocation4] sm:$0xff] %vm1581_vm0, %v2254_v42 }
 0x3f0   : > { %v2228_v29 = vpop.f32.mrf.mxu3 }
 0x3f1   : > { %v2229_v60 = vadd.f32 %v2228_v29, %v2206_v59 }
 0x3f3   : > { %v2252_v50 = vadd.f32 %v2251_v7, %v2229_v60 }
 0x3f5   : > { %v2255_v1 = vmax.f32 %v2252_v50, 0.0 }
 0x3f6   : > { %v2265_v18 = vld [vmem:[#allocation4 + $0x3] sm:$0x1]  ;;  %v2266_v62 = vld [vmem:[#allocation4 + $0x4] sm:$0x1]  ;;  %v2268_v58 = vld [vmem:[#allocation4 + $0x5] sm:$0x1] }
 0x3f7   : > { %2258 = vst.msk [vmem:[#allocation4 + $0x8] sm:$0x7] %vm2257_vm9, %v2255_v1  ;;  %v2267_v21 = vadd.f32 %v2266_v62, %v2265_v18  ;;  %v2271_v54 = vld [vmem:[#allocation4 + $0x6] sm:$0x1]  ;;  %v2272_v12 = vld [vmem:[#allocation4 + $0x7] sm:$0x1] }
 0x3f8   : > { %v2273_v3 = vadd.f32 %v2272_v12, %v2271_v54  ;;  %v2259_v22 = vld [vmem:[#allocation4] sm:$0x1]  ;;  %v2260_v13 = vld [vmem:[#allocation4 + $0x1] sm:$0x1]  ;;  %v2262_v49 = vld [vmem:[#allocation4 + $0x2] sm:$0x1] }
 0x3f9   : > { %v2269_v31 = vadd.f32 %v2268_v58, %v2267_v21  ;;  %v2261_v0 = vadd.f32 %v2260_v13, %v2259_v22 }
 0x3fb   : > { %v2270_v11 = vmul.f32 0.33333334, %v2269_v31  ;;  %v2263_v25 = vadd.f32 %v2262_v49, %v2261_v0 }
 0x3fd   : > { %2278 = vrot.lane.b32.xlu2 %v2270_v11, %s3825_s25  ;;  %v2264_v40 = vmul.f32 0.33333334, %v2263_v25 }
 0x3fe   : > { %v2274_v43 = vld [vmem:[#allocation4 + $0x8] sm:$0x1] }
 0x3ff   : > { %v2275_v53 = vadd.f32 %v2274_v43, %v2273_v3 }
 0x401   : > { %v2276_v2 = vmul.f32 0.33333334, %v2275_v53 }
 0x403   : > { %2282 = vrot.lane.b32.xlu0 %v2276_v2, %s3823_s26  ;;  %s2344_s26 = sshll.u32 %s2340_s23, 4  ;;  %s2345_s26 = int_to_ptr.hbm [resolvable:$true] %s2344_s26 }
 0x404   : > { %s2734_s16 = sshra.s32 %s2345_s26, 4  ;;  %s2735_s16 = int_to_ptr.hbm [resolvable:$true] %s2734_s16 }
 0x405   : > { %s2736_s25 = scalar_lea.hbm %s2735_s16, 1  ;;  %p2741_p0 = scmp.lt.s32.totalorder %s2735_s16, %s3813_s9 }
 0x406   : > { %p2737_p11 = scmp.ne.s32.totalorder %s2735_s16, %s2736_s25  ;;  %p2742_p1 = scmp.lt.s32.totalorder %s2740_s22, %s2736_s25 }
 0x408   : > { %p2738_p12 = pnand %p2737_p11, %p2880_p5  ;;  %p2743_p2 = por %p2742_p1, %p2741_p0 }
 0x40a   : > { %p2739_p13 = pneg %p2738_p12 }
 0x40c   : > { %p2744_p3 = pnand %p2743_p2, %p2739_p13 }
 0x457   : > { %v2279_v33 = vpop.permute.xlu2 %2278 }
 0x458   : > { %v2285_v61 = vsel %vm1581_vm0, %v2264_v40, %v2279_v33 }
 0x475   : > { %v2283_v45 = vpop.permute.xlu0 %2282 }
 0x476   : > { %v2286_v41 = vsel %vm1879_vm1, %v2285_v61, %v2283_v45 }
 0x477   : > { %2547 = vmatmul.msk.f32.vlgmr.msrb.gmra.mxu3 %vm1886_vm2, %v2286_v41 }
 0x4fa   : > { %v2314_v57 = vpop.f32.mrf.mxu3 }
 0x4fb   : > { %v2315_v24 = vadd.f32 %v2314_v57, %v2293_v20 }
 0x4fd   : > { %v2318_v46 = vsel %vm2317_vm10, %v2315_v24, -inf }
 0x4fe   : > { %2319 = vmax.xlane.f32.xlu1 %v2318_v46 }
 0x571   : > { %v2320_v17 = vpop.xlane.xlu1 %2319 }
 0x572   : > { %v2321_v28 = vsub.f32 %v2315_v24, %v2320_v17 }
 0x574   : > { %v2322_v27 = vmul.f32 1.442695, %v2321_v28 }
 0x576   : > { %2708 = vpow2.f32 %v2322_v27 }
 0x57c   : > { %v2709_v56 = vpop.eup %2708 }
 0x57d   : > { %v2324_v51 = vsel %vm2317_vm10, %v2709_v56, 0.0 }
 0x57e   : > { %2325 = vadd.xlane.f32.xlu2 %v2324_v51 }
 0x5f1   : > { %v2326_v55 = vpop.xlane.xlu2 %2325 }
 0x5f2   : > { %2710 = vlog2.f32 %v2326_v55 }
 0x5f8   : > { %v2711_v30 = vpop.eup %2710 }
 0x5f9   : > { %v2328_v38 = vmul.f32 0.6931472, %v2711_v30 }
 0x5fb   : > { %v2329_v63 = vsub.f32 %v2321_v28, %v2328_v38 }
 0x5fd   : > { %2330 = vst.msk [vmem:[%s324_s24] sm:$0x1] %vm2317_vm10, %v2329_v63 }
 0x5fe   : > { %2747 = shalt.err (!%p2744_p3)
}
 0x5ff   : > { %2551 = dma.vmem_to_hbm [thread:$0]  (%p2880_p5), %s2343_s29, 16, %s2345_s26, %s2332_s14  }
 0x600 PF: > { %p2557_p4 = scmp.ge.s32.totalorder %s2782_s12, 2  ;;  %s2356_s17 = sand.u32 1, %s2770_s30  }
 0x601   : > { %s2357_s23 = scalar_lea.sflag [#allocation6], %s2356_s17 }
 0x602   : > { %p2554_p7 = pnand %p2557_p4, %p2884_p6 }
 0x604   : > { %p2555_p8 = pneg %p2554_p7 }
 0x606   : > { %2765 = dma.done.wait (%p2555_p8), %s2357_s23, 16  }
 0x607   : > { %2767 = vsyncadd (%p2555_p8), %s2357_s23, 4294967280  ;;  %p19_p9 = scmp.ge.s32.totalorder %s2867_s15, 4   ;;  %s3826_s30 = smov %s2774_s10 }
 0x608   : > { %s3827_s10 = smov %s2778_s11  ;;  %s3828_s11 = smov %s2878_s18 }
 0x609   : > { %s3829_s12 = smov %s2867_s15  ;;  %21 = sbr.rel (!%p19_p9) target bundleno = 3 (0x3), region = 295 }
 0x60e   :  { %2362 = vsyncpa [#allocation6], 1 }
 0x60f   :  { %2364 = vsyncpa [#allocation6 + $0x1], 1 }

</bundles_post_ra>
